<compile_context>
chip_gen: v6e
topology: v6e:2x2x1
jax: 0.10.0
libtpu: 0.0.40
codegen_flags: <defaults>
</compile_context>

<pallas_src>
import functools

import jax
import jax.numpy as jnp
from jax.experimental import pallas as pl
from jax.experimental.pallas import tpu as pltpu

_LN_EPS = 1e-6      # timm ViT LayerNorm eps.  TODO(synk): confirm vs nn.LayerNorm 1e-5.
_VMEM_LIMIT = 48 * 1024 * 1024   # sized for v7x's 64 MiB physical VMEM (32 MiB scoped default)


def _compiler_params():
    return pltpu.CompilerParams(
        dimension_semantics=("parallel",),   # batch axis -> both TCs on v7x megacore
        vmem_limit_bytes=_VMEM_LIMIT,
    )


def _full_spec(shape):
    """Whole-array block (index constant across the batch grid -> loaded once)."""
    return pl.BlockSpec(tuple(shape), lambda b: (0,) * len(shape))


def _batch_spec(shape):
    """Per-batch-element block of a (B, ...) array."""
    return pl.BlockSpec((1,) + tuple(shape), lambda b: (b,) + (0,) * len(shape))


# ----------------------------- in-kernel helpers -----------------------------

def _ln(x, g, b):
    """LayerNorm over the last axis, f32."""
    mu = jnp.mean(x, axis=-1, keepdims=True)
    var = jnp.mean((x - mu) ** 2, axis=-1, keepdims=True)
    return (x - mu) * jax.lax.rsqrt(var + _LN_EPS) * g + b


# ----------------------------- Pallas kernels -----------------------------

def _embed_kernel(p_ref, w_ref, b_ref, pos_ref, o_ref):
    """ViT patch embedding (Conv2d stride=P as per-token linear) + pos-emb add."""
    y = jnp.dot(p_ref[0].astype(w_ref.dtype), w_ref[...],
                preferred_element_type=jnp.float32)
    o_ref[0] = (y + b_ref[...] + pos_ref[...]).astype(o_ref.dtype)


def _block_kernel(x_ref, ln1g_ref, ln1b_ref, wqkv_ref, bqkv_ref, wproj_ref, bproj_ref,
                  ln2g_ref, ln2b_ref, wfc1_ref, bfc1_ref, wfc2_ref, bfc2_ref,
                  o_ref, *, num_heads):
    """Fused pre-LN transformer block for one batch element: attention + MLP."""
    x = x_ref[0].astype(jnp.float32)                     # (N, D) residual stream
    n, d = x.shape
    dh = d // num_heads
    scale = 1.0 / (dh ** 0.5)

    # ---- attention: LN -> fused QKV matmul -> per-head SDPA -> out proj -> residual
    h = _ln(x, ln1g_ref[...], ln1b_ref[...])
    qkv = jnp.dot(h.astype(wqkv_ref.dtype), wqkv_ref[...],
                  preferred_element_type=jnp.float32) + bqkv_ref[...]   # (N, 3D) f32
    heads = []
    for hd in range(num_heads):                          # static unroll (num_heads small)
        q = qkv[:, hd * dh:(hd + 1) * dh].astype(jnp.bfloat16)
        k = qkv[:, d + hd * dh:d + (hd + 1) * dh].astype(jnp.bfloat16)
        v = qkv[:, 2 * d + hd * dh:2 * d + (hd + 1) * dh].astype(jnp.bfloat16)
        s = jax.lax.dot_general(q, k, (((1,), (1,)), ((), ())),
                                preferred_element_type=jnp.float32) * scale   # (N, N)
        s = s - jnp.max(s, axis=-1, keepdims=True)
        p = jnp.exp(s)
        p = p * pl.reciprocal(jnp.sum(p, axis=-1, keepdims=True), approx=True)
        heads.append(jnp.dot(p.astype(jnp.bfloat16), v,
                             preferred_element_type=jnp.float32))             # (N, Dh)
    # TODO(synk): at production N (hundreds of tokens, Dh=64) this becomes a
    # flash-style kv-tiled online softmax with the kv axis as an 'arbitrary' grid dim.
    attn = jnp.concatenate(heads, axis=-1)               # (N, D)
    attn = jnp.dot(attn.astype(wproj_ref.dtype), wproj_ref[...],
                   preferred_element_type=jnp.float32) + bproj_ref[...]
    x = x + attn

    # ---- MLP: LN -> FC1 + GELU -> FC2 -> residual
    h = _ln(x, ln2g_ref[...], ln2b_ref[...])
    f = jnp.dot(h.astype(wfc1_ref.dtype), wfc1_ref[...],
                preferred_element_type=jnp.float32) + bfc1_ref[...]
    # TODO(synk): PyTorch ViT MLP uses exact (erf) GELU; tanh approximation used here.
    f = jax.nn.gelu(f, approximate=True)
    f = jnp.dot(f.astype(wfc2_ref.dtype), wfc2_ref[...],
                preferred_element_type=jnp.float32) + bfc2_ref[...]
    o_ref[0] = (x + f).astype(o_ref.dtype)


def _bottleneck_kernel(x_ref, lng_ref, lnb_ref, wq_ref, bq_ref, cb_ref,
                       wpq_ref, bpq_ref, pos_ref, dec_ref, loss_ref,
                       *, commitment_weight, norm_latents, inv_count):
    """Final enc LN -> quant_proj -> lucid cosine-sim VQ -> post_quant_proj -> +dec pos-emb."""
    x = x_ref[0].astype(jnp.float32)                     # (N, enc_dim)
    h = _ln(x, lng_ref[...], lnb_ref[...])               # final encoder LayerNorm
    z = jnp.dot(h.astype(wq_ref.dtype), wq_ref[...],
                preferred_element_type=jnp.float32) + bq_ref[...]       # (N, latent)

    # --- cosine-sim VQ (norm_codes=True); reductions / argmax kept in f32 ---
    zn = z * jax.lax.rsqrt(jnp.sum(z * z, axis=-1, keepdims=True) + 1e-12)
    cb = cb_ref[...].astype(jnp.float32)
    cbn = cb * jax.lax.rsqrt(jnp.sum(cb * cb, axis=-1, keepdims=True) + 1e-12)
    sim = jax.lax.dot_general(zn, cbn, (((1,), (1,)), ((), ())),
                              preferred_element_type=jnp.float32)       # (N, K)
    k_size = sim.shape[-1]
    max_sim = jnp.max(sim, axis=-1, keepdims=True)
    lane = jax.lax.broadcasted_iota(jnp.int32, sim.shape, 1)
    idx = jnp.min(jnp.where(sim == max_sim, lane, k_size), axis=-1, keepdims=True)
    onehot = (lane == idx).astype(jnp.float32)
    # TODO(synk): for production codebooks (16k codes) stream the K axis with a
    # running max/argmax + DMA gather instead of materializing (N, K) and the
    # one-hot select matmul.
    quant = jnp.dot(onehot, cbn, preferred_element_type=jnp.float32)    # (N, latent)

    # commitment loss partial for this batch element (mse 'mean' over all elements)
    target = zn if norm_latents else z
    sq = jnp.sum((quant - target) ** 2) * (commitment_weight * inv_count)
    loss_ref[0] = jnp.full(loss_ref.shape[1:], sq, dtype=jnp.float32)   # lane-dense slab

    # --- post_quant_proj (1x1 conv) + decoder pos-emb ---
    d = jnp.dot(quant.astype(wpq_ref.dtype), wpq_ref[...],
                preferred_element_type=jnp.float32) + bpq_ref[...] + pos_ref[...]
    dec_ref[0] = d.astype(dec_ref.dtype)


def _dec_head_kernel(x_ref, lng_ref, lnb_ref, w_ref, b_ref, o_ref):
    """Final decoder LN + to-pixels projection."""
    x = x_ref[0].astype(jnp.float32)
    h = _ln(x, lng_ref[...], lnb_ref[...])
    y = jnp.dot(h.astype(w_ref.dtype), w_ref[...],
                preferred_element_type=jnp.float32) + b_ref[...]
    o_ref[0] = y.astype(o_ref.dtype)


# ----------------------------- kernel wrappers -----------------------------

def patch_embed(patches, w, b, pos):
    B, N, CPP = patches.shape
    D = w.shape[1]
    args = (patches, w, b, pos)
    in_specs = [_batch_spec((N, CPP))] + [_full_spec(a.shape) for a in args[1:]]
    return pl.pallas_call(
        _embed_kernel,
        out_shape=jax.ShapeDtypeStruct((B, N, D), jnp.float32),
        grid=(B,),
        in_specs=in_specs,
        out_specs=_batch_spec((N, D)),
        compiler_params=_compiler_params(),
    )(*args)


def transformer_block(x, p, num_heads):
    B, N, D = x.shape
    mlp = p["w_fc1"].shape[1]
    flops = 2 * B * N * D * (3 * D + 2 * N + D + 2 * mlp)
    trans = B * N * (num_heads * N + mlp)
    nbytes = int((x.size + B * N * D) * 4
                 + sum(int(v.size) * v.dtype.itemsize for v in p.values()))
    kern = functools.partial(_block_kernel, num_heads=num_heads)
    args = (x, p["ln1_g"], p["ln1_b"], p["w_qkv"], p["b_qkv"], p["w_proj"], p["b_proj"],
            p["ln2_g"], p["ln2_b"], p["w_fc1"], p["b_fc1"], p["w_fc2"], p["b_fc2"])
    in_specs = [_batch_spec((N, D))] + [_full_spec(a.shape) for a in args[1:]]
    return pl.pallas_call(
        kern,
        out_shape=jax.ShapeDtypeStruct((B, N, D), jnp.float32),
        grid=(B,),
        in_specs=in_specs,
        out_specs=_batch_spec((N, D)),
        compiler_params=_compiler_params(),
        cost_estimate=pl.CostEstimate(flops=int(flops), transcendentals=int(trans),
                                      bytes_accessed=nbytes),
    )(*args)


def vq_bottleneck(h, enc_ln_g, enc_ln_b, wq, bq, codebook, wpq, bpq, dec_pos,
                  commitment_weight, norm_latents):
    B, N, Denc = h.shape
    latent = wq.shape[1]
    Ddec = wpq.shape[1]
    inv_count = 1.0 / float(B * N * latent)   # F.mse_loss(reduction='mean')
    kern = functools.partial(_bottleneck_kernel,
                             commitment_weight=float(commitment_weight),
                             norm_latents=bool(norm_latents),
                             inv_count=inv_count)
    args = (h, enc_ln_g, enc_ln_b, wq, bq, codebook, wpq, bpq, dec_pos)
    in_specs = [_batch_spec((N, Denc))] + [_full_spec(a.shape) for a in args[1:]]
    dec_in, loss_slab = pl.pallas_call(
        kern,
        out_shape=(jax.ShapeDtypeStruct((B, N, Ddec), jnp.float32),
                   jax.ShapeDtypeStruct((B, 8, 128), jnp.float32)),
        grid=(B,),
        in_specs=in_specs,
        out_specs=(_batch_spec((N, Ddec)), _batch_spec((8, 128))),
        compiler_params=_compiler_params(),
    )(*args)
    code_loss = jnp.sum(loss_slab[:, 0, 0])   # tiny XLA reduction over batch partials
    return dec_in, code_loss


def decoder_head(x, ln_g, ln_b, w, b):
    B, N, D = x.shape
    out_dim = w.shape[1]
    args = (x, ln_g, ln_b, w, b)
    in_specs = [_batch_spec((N, D))] + [_full_spec(a.shape) for a in args[1:]]
    return pl.pallas_call(
        _dec_head_kernel,
        out_shape=jax.ShapeDtypeStruct((B, N, out_dim), jnp.float32),
        grid=(B,),
        in_specs=in_specs,
        out_specs=_batch_spec((N, out_dim)),
        compiler_params=_compiler_params(),
    )(*args)


# ----------------------------- parameter init -----------------------------

def _dense(key, din, dout, scale=0.02):
    # Matmul weights stored in bf16 (MXU-native on v6e/v7x, halves HBM/VMEM traffic).
    return (jax.random.normal(key, (din, dout), jnp.float32) * scale).astype(jnp.bfloat16)


def _init_block(key, dim, mlp_dim):
    ks = jax.random.split(key, 4)
    return dict(
        ln1_g=jnp.ones((1, dim), jnp.float32), ln1_b=jnp.zeros((1, dim), jnp.float32),
        w_qkv=_dense(ks[0], dim, 3 * dim), b_qkv=jnp.zeros((1, 3 * dim), jnp.float32),
        w_proj=_dense(ks[1], dim, dim), b_proj=jnp.zeros((1, dim), jnp.float32),
        ln2_g=jnp.ones((1, dim), jnp.float32), ln2_b=jnp.zeros((1, dim), jnp.float32),
        w_fc1=_dense(ks[2], dim, mlp_dim), b_fc1=jnp.zeros((1, mlp_dim), jnp.float32),
        w_fc2=_dense(ks[3], mlp_dim, dim), b_fc2=jnp.zeros((1, dim), jnp.float32),
    )


def init_vqvae_params(key, cfg):
    C, P = cfg["n_channels"], cfg["patch_size"]
    Hq = cfg["image_size"] // P
    N = Hq * Hq
    enc_dim, dec_dim, latent = cfg["enc_dim"], cfg["dec_dim"], cfg["latent_dim"]
    mlp_e, mlp_d = enc_dim * cfg["mlp_ratio"], dec_dim * cfg["mlp_ratio"]
    ks = jax.random.split(key, 16)

    enc = dict(
        patch_w=_dense(ks[0], C * P * P, enc_dim),          # ViT patch-proj (Conv2d stride=P)
        patch_b=jnp.zeros((1, enc_dim), jnp.float32),
        pos_emb=jax.random.normal(ks[1], (N, enc_dim), jnp.float32) * 0.02,
        blocks=[_init_block(ks[2 + i], enc_dim, mlp_e) for i in range(cfg["depth"])],
        ln_g=jnp.ones((1, enc_dim), jnp.float32), ln_b=jnp.zeros((1, enc_dim), jnp.float32),
    )
    dec = dict(
        pos_emb=jax.random.normal(ks[6], (N, dec_dim), jnp.float32) * 0.02,
        blocks=[_init_block(ks[7 + i], dec_dim, mlp_d) for i in range(cfg["depth"])],
        ln_g=jnp.ones((1, dec_dim), jnp.float32), ln_b=jnp.zeros((1, dec_dim), jnp.float32),
        out_w=_dense(ks[11], dec_dim, C * P * P),            # to-pixels projection
        out_b=jnp.zeros((1, C * P * P), jnp.float32),
    )
    return dict(
        enc=enc,
        quant_proj_w=_dense(ks[12], enc_dim, latent),        # 1x1 conv == per-token linear
        quant_proj_b=jnp.zeros((1, latent), jnp.float32),
        codebook=jax.random.normal(ks[13], (cfg["codebook_size"], latent), jnp.float32),
        post_quant_proj_w=_dense(ks[14], latent, dec_dim),   # 1x1 conv == per-token linear
        post_quant_proj_b=jnp.zeros((1, dec_dim), jnp.float32),
        dec=dec,
    )


# ----------------------------- VQVAE forward -----------------------------

def vqvae_forward(x, params, cfg):
    """x: (B, C, H, W) NCHW.  Returns (dec (B, C, H, W), code_loss scalar)."""
    B, C, H, W = x.shape
    P = cfg["patch_size"]
    Hq, Wq = H // P, W // P
    N = Hq * Wq

    # --- patchify (flatten order C, ph, pw == Conv2d stride-P patch embed) ---
    patches = (x.reshape(B, C, Hq, P, Wq, P)
                 .transpose(0, 2, 4, 1, 3, 5)
                 .reshape(B, N, C * P * P))

    enc = params["enc"]
    h = patch_embed(patches, enc["patch_w"], enc["patch_b"], enc["pos_emb"])
    for blk in enc["blocks"]:
        h = transformer_block(h, blk, cfg["num_heads"])

    # --- final enc LN + quant_proj + cosine-sim VQ + post_quant_proj + dec pos-emb ---
    dec_params = params["dec"]
    d, code_loss = vq_bottleneck(
        h, enc["ln_g"], enc["ln_b"],
        params["quant_proj_w"], params["quant_proj_b"],
        params["codebook"],
        params["post_quant_proj_w"], params["post_quant_proj_b"],
        dec_params["pos_emb"],
        cfg["commitment_weight"], cfg["norm_latents"])

    for blk in dec_params["blocks"]:
        d = transformer_block(d, blk, cfg["num_heads"])
    out_patches = decoder_head(d, dec_params["ln_g"], dec_params["ln_b"],
                               dec_params["out_w"], dec_params["out_b"])

    dec = (out_patches.reshape(B, Hq, Wq, C, P, P)
                      .transpose(0, 3, 1, 4, 2, 5)
                      .reshape(B, C, H, W))
    return dec, code_loss


# ----------------------------- main -----------------------------

if __name__ == "__main__":
    cfg = dict(
        image_size=16,
        n_channels=4,
        patch_size=8,        # -> 2x2 latent grid, 4 tokens per image
        enc_dim=32,
        dec_dim=32,
        latent_dim=32,
        codebook_size=64,
        num_heads=2,
        depth=1,
        mlp_ratio=2,
        commitment_weight=1.0,
        norm_latents=False,  # VQ default: commitment loss on un-normalized latents
    )
    key = jax.random.PRNGKey(0)
    pkey, xkey = jax.random.split(key)
    params = init_vqvae_params(pkey, cfg)
    x = jax.random.normal(
        xkey, (2, cfg["n_channels"], cfg["image_size"], cfg["image_size"]), jnp.float32)

    fwd = jax.jit(functools.partial(vqvae_forward, cfg=cfg))
    dec, code_loss = fwd(x, params)
    jax.block_until_ready((dec, code_loss))

    assert dec.shape == x.shape, dec.shape
    assert code_loss.shape == (), code_loss.shape
    print("KERNEL_OK")
</pallas_src>

<mosaic_0001>
module attributes {stable_mosaic.version = 11 : i64} {
  func.func @_embed_kernel(%arg0: i32, %arg1: memref<1x4x256xf32, #tpu.memory_space<vmem>>, %arg2: memref<256x32xbf16, #tpu.memory_space<vmem>>, %arg3: memref<1x32xf32, #tpu.memory_space<vmem>>, %arg4: memref<4x32xf32, #tpu.memory_space<vmem>>, %arg5: memref<1x4x32xf32, #tpu.memory_space<vmem>>) attributes {dimension_semantics = [#tpu.dimension_semantics<parallel>], iteration_bounds = array<i64: 2>, scalar_prefetch = 0 : i64, scratch_operands = 0 : i64, tpu.core_type = #tpu.core_type<tc>, window_params = [{transform_indices = @transform_0, window_bounds = array<i64: 1, 4, 256>}, {pipeline_mode = #tpu.pipeline_mode<synchronous>, transform_indices = @transform_1, window_bounds = array<i64: 256, 32>}, {pipeline_mode = #tpu.pipeline_mode<synchronous>, transform_indices = @transform_2, window_bounds = array<i64: 1, 32>}, {pipeline_mode = #tpu.pipeline_mode<synchronous>, transform_indices = @transform_3, window_bounds = array<i64: 4, 32>}, {transform_indices = @transform_4, window_bounds = array<i64: 1, 4, 32>}]} {
    %c0 = arith.constant 0 : index
    %c0_0 = arith.constant 0 : index
    %c0_1 = arith.constant 0 : index
    %0 = vector.load %arg1[%c0, %c0_0, %c0_1] : memref<1x4x256xf32, #tpu.memory_space<vmem>>, vector<1x4x256xf32>
    %1 = vector.shape_cast %0 : vector<1x4x256xf32> to vector<4x256xf32>
    %2 = arith.truncf %1 : vector<4x256xf32> to vector<4x256xbf16>
    %c0_2 = arith.constant 0 : index
    %c0_3 = arith.constant 0 : index
    %3 = vector.load %arg2[%c0_2, %c0_3] : memref<256x32xbf16, #tpu.memory_space<vmem>>, vector<256x32xbf16>
    %cst = arith.constant dense<0.000000e+00> : vector<4x32xf32>
    %4 = tpu.matmul %2, %3, %cst {dimension_numbers = #tpu.dot_dimension_numbers<[1], [0], [0], [1], [0, 0, 1, 1], [], []>} : vector<4x256xbf16>, vector<256x32xbf16>, vector<4x32xf32> -> vector<4x32xf32>
    %c0_4 = arith.constant 0 : index
    %c0_5 = arith.constant 0 : index
    %5 = vector.load %arg3[%c0_4, %c0_5] : memref<1x32xf32, #tpu.memory_space<vmem>>, vector<1x32xf32>
    %6 = vector.broadcast %5 : vector<1x32xf32> to vector<4x32xf32>
    %7 = arith.addf %4, %6 : vector<4x32xf32>
    %c0_6 = arith.constant 0 : index
    %c0_7 = arith.constant 0 : index
    %8 = vector.load %arg4[%c0_6, %c0_7] : memref<4x32xf32, #tpu.memory_space<vmem>>, vector<4x32xf32>
    %9 = arith.addf %7, %8 : vector<4x32xf32>
    %c0_8 = arith.constant 0 : index
    %c0_9 = arith.constant 0 : index
    %c0_10 = arith.constant 0 : index
    %10 = vector.load %arg5[%c0_8, %c0_9, %c0_10] : memref<1x4x32xf32, #tpu.memory_space<vmem>>, vector<1x4x32xf32>
    %11 = vector.shape_cast %10 : vector<1x4x32xf32> to vector<4x32xf32>
    %12 = vector.shape_cast %9 : vector<4x32xf32> to vector<1x4x32xf32>
    tpu.vector_store %arg5[%c0_8, %c0_9, %c0_10], %12 {strides = array<i32>} : memref<1x4x32xf32, #tpu.memory_space<vmem>>, vector<1x4x32xf32>,
    return
  }
  func.func @transform_0(%arg0: i32) -> (i32, i32, i32) {
    %c0_i32 = arith.constant 0 : i32
    %c0_i32_0 = arith.constant 0 : i32
    %c0_i32_1 = arith.constant 0 : i32
    return %arg0, %c0_i32, %c0_i32_0 : i32, i32, i32
  }
  func.func @transform_1(%arg0: i32) -> (i32, i32) {
    %c0_i32 = arith.constant 0 : i32
    %c0_i32_0 = arith.constant 0 : i32
    %c0_i32_1 = arith.constant 0 : i32
    return %c0_i32, %c0_i32_0 : i32, i32
  }
  func.func @transform_2(%arg0: i32) -> (i32, i32) {
    %c0_i32 = arith.constant 0 : i32
    %c0_i32_0 = arith.constant 0 : i32
    %c0_i32_1 = arith.constant 0 : i32
    return %c0_i32, %c0_i32_0 : i32, i32
  }
  func.func @transform_3(%arg0: i32) -> (i32, i32) {
    %c0_i32 = arith.constant 0 : i32
    %c0_i32_0 = arith.constant 0 : i32
    %c0_i32_1 = arith.constant 0 : i32
    return %c0_i32, %c0_i32_0 : i32, i32
  }
  func.func @transform_4(%arg0: i32) -> (i32, i32, i32) {
    %c0_i32 = arith.constant 0 : i32
    %c0_i32_0 = arith.constant 0 : i32
    %c0_i32_1 = arith.constant 0 : i32
    return %arg0, %c0_i32, %c0_i32_0 : i32, i32, i32
  }
}

module attributes {stable_mosaic.version = 11 : i64} {
  func.func @_dec_head_kernel(%arg0: i32, %arg1: memref<1x4x32xf32, #tpu.memory_space<vmem>>, %arg2: memref<1x32xf32, #tpu.memory_space<vmem>>, %arg3: memref<1x32xf32, #tpu.memory_space<vmem>>, %arg4: memref<32x256xbf16, #tpu.memory_space<vmem>>, %arg5: memref<1x256xf32, #tpu.memory_space<vmem>>, %arg6: memref<1x4x256xf32, #tpu.memory_space<vmem>>) attributes {dimension_semantics = [#tpu.dimension_semantics<parallel>], iteration_bounds = array<i64: 2>, scalar_prefetch = 0 : i64, scratch_operands = 0 : i64, tpu.core_type = #tpu.core_type<tc>, window_params = [{transform_indices = @transform_0, window_bounds = array<i64: 1, 4, 32>}, {pipeline_mode = #tpu.pipeline_mode<synchronous>, transform_indices = @transform_1, window_bounds = array<i64: 1, 32>}, {pipeline_mode = #tpu.pipeline_mode<synchronous>, transform_indices = @transform_2, window_bounds = array<i64: 1, 32>}, {pipeline_mode = #tpu.pipeline_mode<synchronous>, transform_indices = @transform_3, window_bounds = array<i64: 32, 256>}, {pipeline_mode = #tpu.pipeline_mode<synchronous>, transform_indices = @transform_4, window_bounds = array<i64: 1, 256>}, {transform_indices = @transform_5, window_bounds = array<i64: 1, 4, 256>}]} {
    %c0 = arith.constant 0 : index
    %c0_0 = arith.constant 0 : index
    %c0_1 = arith.constant 0 : index
    %0 = vector.load %arg1[%c0, %c0_0, %c0_1] : memref<1x4x32xf32, #tpu.memory_space<vmem>>, vector<1x4x32xf32>
    %1 = vector.shape_cast %0 : vector<1x4x32xf32> to vector<4x32xf32>
    %c0_2 = arith.constant 0 : index
    %c0_3 = arith.constant 0 : index
    %2 = vector.load %arg2[%c0_2, %c0_3] : memref<1x32xf32, #tpu.memory_space<vmem>>, vector<1x32xf32>
    %c0_4 = arith.constant 0 : index
    %c0_5 = arith.constant 0 : index
    %3 = vector.load %arg3[%c0_4, %c0_5] : memref<1x32xf32, #tpu.memory_space<vmem>>, vector<1x32xf32>
    %cst = arith.constant dense<0.000000e+00> : vector<4xf32>
    %4 = vector.multi_reduction <add>, %1, %cst [1] : vector<4x32xf32> to vector<4xf32>
    %5 = vector.shape_cast %4 : vector<4xf32> to vector<4x1xf32>
    %cst_6 = arith.constant 3.200000e+01 : f32
    %6 = vector.broadcast %cst_6 : f32 to vector<4x1xf32>
    %7 = arith.divf %5, %6 : vector<4x1xf32>
    %8 = vector.broadcast %7 : vector<4x1xf32> to vector<4x32xf32>
    %9 = arith.subf %1, %8 : vector<4x32xf32>
    %10 = arith.mulf %9, %9 : vector<4x32xf32>
    %cst_7 = arith.constant dense<0.000000e+00> : vector<4xf32>
    %11 = vector.multi_reduction <add>, %10, %cst_7 [1] : vector<4x32xf32> to vector<4xf32>
    %12 = vector.shape_cast %11 : vector<4xf32> to vector<4x1xf32>
    %cst_8 = arith.constant 3.200000e+01 : f32
    %13 = vector.broadcast %cst_8 : f32 to vector<4x1xf32>
    %14 = arith.divf %12, %13 : vector<4x1xf32>
    %15 = vector.broadcast %7 : vector<4x1xf32> to vector<4x32xf32>
    %16 = arith.subf %1, %15 : vector<4x32xf32>
    %cst_9 = arith.constant 9.99999997E-7 : f32
    %17 = vector.broadcast %cst_9 : f32 to vector<4x1xf32>
    %18 = arith.addf %14, %17 : vector<4x1xf32>
    %19 = math.rsqrt %18 : vector<4x1xf32>
    %20 = vector.broadcast %19 : vector<4x1xf32> to vector<4x32xf32>
    %21 = arith.mulf %16, %20 : vector<4x32xf32>
    %22 = vector.broadcast %2 : vector<1x32xf32> to vector<4x32xf32>
    %23 = arith.mulf %21, %22 : vector<4x32xf32>
    %24 = vector.broadcast %3 : vector<1x32xf32> to vector<4x32xf32>
    %25 = arith.addf %23, %24 : vector<4x32xf32>
    %26 = arith.truncf %25 : vector<4x32xf32> to vector<4x32xbf16>
    %c0_10 = arith.constant 0 : index
    %c0_11 = arith.constant 0 : index
    %27 = vector.load %arg4[%c0_10, %c0_11] : memref<32x256xbf16, #tpu.memory_space<vmem>>, vector<32x256xbf16>
    %cst_12 = arith.constant dense<0.000000e+00> : vector<4x256xf32>
    %28 = tpu.matmul %26, %27, %cst_12 {dimension_numbers = #tpu.dot_dimension_numbers<[1], [0], [0], [1], [0, 0, 1, 1], [], []>} : vector<4x32xbf16>, vector<32x256xbf16>, vector<4x256xf32> -> vector<4x256xf32>
    %c0_13 = arith.constant 0 : index
    %c0_14 = arith.constant 0 : index
    %29 = vector.load %arg5[%c0_13, %c0_14] : memref<1x256xf32, #tpu.memory_space<vmem>>, vector<1x256xf32>
    %30 = vector.broadcast %29 : vector<1x256xf32> to vector<4x256xf32>
    %31 = arith.addf %28, %30 : vector<4x256xf32>
    %c0_15 = arith.constant 0 : index
    %c0_16 = arith.constant 0 : index
    %c0_17 = arith.constant 0 : index
    %32 = vector.load %arg6[%c0_15, %c0_16, %c0_17] : memref<1x4x256xf32, #tpu.memory_space<vmem>>, vector<1x4x256xf32>
    %33 = vector.shape_cast %32 : vector<1x4x256xf32> to vector<4x256xf32>
    %34 = vector.shape_cast %31 : vector<4x256xf32> to vector<1x4x256xf32>
    tpu.vector_store %arg6[%c0_15, %c0_16, %c0_17], %34 {strides = array<i32>} : memref<1x4x256xf32, #tpu.memory_space<vmem>>, vector<1x4x256xf32>,
    return
  }
  func.func @transform_0(%arg0: i32) -> (i32, i32, i32) {
    %c0_i32 = arith.constant 0 : i32
    %c0_i32_0 = arith.constant 0 : i32
    %c0_i32_1 = arith.constant 0 : i32
    return %arg0, %c0_i32, %c0_i32_0 : i32, i32, i32
  }
  func.func @transform_1(%arg0: i32) -> (i32, i32) {
    %c0_i32 = arith.constant 0 : i32
    %c0_i32_0 = arith.constant 0 : i32
    %c0_i32_1 = arith.constant 0 : i32
    return %c0_i32, %c0_i32_0 : i32, i32
  }
  func.func @transform_2(%arg0: i32) -> (i32, i32) {
    %c0_i32 = arith.constant 0 : i32
    %c0_i32_0 = arith.constant 0 : i32
    %c0_i32_1 = arith.constant 0 : i32
    return %c0_i32, %c0_i32_0 : i32, i32
  }
  func.func @transform_3(%arg0: i32) -> (i32, i32) {
    %c0_i32 = arith.constant 0 : i32
    %c0_i32_0 = arith.constant 0 : i32
    %c0_i32_1 = arith.constant 0 : i32
    return %c0_i32, %c0_i32_0 : i32, i32
  }
  func.func @transform_4(%arg0: i32) -> (i32, i32) {
    %c0_i32 = arith.constant 0 : i32
    %c0_i32_0 = arith.constant 0 : i32
    %c0_i32_1 = arith.constant 0 : i32
    return %c0_i32, %c0_i32_0 : i32, i32
  }
  func.func @transform_5(%arg0: i32) -> (i32, i32, i32) {
    %c0_i32 = arith.constant 0 : i32
    %c0_i32_0 = arith.constant 0 : i32
    %c0_i32_1 = arith.constant 0 : i32
    return %arg0, %c0_i32, %c0_i32_0 : i32, i32, i32
  }
}

module attributes {stable_mosaic.version = 11 : i64} {
  func.func @_block_kernel(%arg0: i32, %arg1: memref<1x4x32xf32, #tpu.memory_space<vmem>>, %arg2: memref<1x32xf32, #tpu.memory_space<vmem>>, %arg3: memref<1x32xf32, #tpu.memory_space<vmem>>, %arg4: memref<32x96xbf16, #tpu.memory_space<vmem>>, %arg5: memref<1x96xf32, #tpu.memory_space<vmem>>, %arg6: memref<32x32xbf16, #tpu.memory_space<vmem>>, %arg7: memref<1x32xf32, #tpu.memory_space<vmem>>, %arg8: memref<1x32xf32, #tpu.memory_space<vmem>>, %arg9: memref<1x32xf32, #tpu.memory_space<vmem>>, %arg10: memref<32x64xbf16, #tpu.memory_space<vmem>>, %arg11: memref<1x64xf32, #tpu.memory_space<vmem>>, %arg12: memref<64x32xbf16, #tpu.memory_space<vmem>>, %arg13: memref<1x32xf32, #tpu.memory_space<vmem>>, %arg14: memref<1x4x32xf32, #tpu.memory_space<vmem>>) attributes {dimension_semantics = [#tpu.dimension_semantics<parallel>], iteration_bounds = array<i64: 2>, scalar_prefetch = 0 : i64, scratch_operands = 0 : i64, tpu.core_type = #tpu.core_type<tc>, window_params = [{transform_indices = @transform_0, window_bounds = array<i64: 1, 4, 32>}, {pipeline_mode = #tpu.pipeline_mode<synchronous>, transform_indices = @transform_1, window_bounds = array<i64: 1, 32>}, {pipeline_mode = #tpu.pipeline_mode<synchronous>, transform_indices = @transform_2, window_bounds = array<i64: 1, 32>}, {pipeline_mode = #tpu.pipeline_mode<synchronous>, transform_indices = @transform_3, window_bounds = array<i64: 32, 96>}, {pipeline_mode = #tpu.pipeline_mode<synchronous>, transform_indices = @transform_4, window_bounds = array<i64: 1, 96>}, {pipeline_mode = #tpu.pipeline_mode<synchronous>, transform_indices = @transform_5, window_bounds = array<i64: 32, 32>}, {pipeline_mode = #tpu.pipeline_mode<synchronous>, transform_indices = @transform_6, window_bounds = array<i64: 1, 32>}, {pipeline_mode = #tpu.pipeline_mode<synchronous>, transform_indices = @transform_7, window_bounds = array<i64: 1, 32>}, {pipeline_mode = #tpu.pipeline_mode<synchronous>, transform_indices = @transform_8, window_bounds = array<i64: 1, 32>}, {pipeline_mode = #tpu.pipeline_mode<synchronous>, transform_indices = @transform_9, window_bounds = array<i64: 32, 64>}, {pipeline_mode = #tpu.pipeline_mode<synchronous>, transform_indices = @transform_10, window_bounds = array<i64: 1, 64>}, {pipeline_mode = #tpu.pipeline_mode<synchronous>, transform_indices = @transform_11, window_bounds = array<i64: 64, 32>}, {pipeline_mode = #tpu.pipeline_mode<synchronous>, transform_indices = @transform_12, window_bounds = array<i64: 1, 32>}, {transform_indices = @transform_13, window_bounds = array<i64: 1, 4, 32>}]} {
    %c0 = arith.constant 0 : index
    %c0_0 = arith.constant 0 : index
    %c0_1 = arith.constant 0 : index
    %0 = vector.load %arg1[%c0, %c0_0, %c0_1] : memref<1x4x32xf32, #tpu.memory_space<vmem>>, vector<1x4x32xf32>
    %1 = vector.shape_cast %0 : vector<1x4x32xf32> to vector<4x32xf32>
    %c0_2 = arith.constant 0 : index
    %c0_3 = arith.constant 0 : index
    %2 = vector.load %arg2[%c0_2, %c0_3] : memref<1x32xf32, #tpu.memory_space<vmem>>, vector<1x32xf32>
    %c0_4 = arith.constant 0 : index
    %c0_5 = arith.constant 0 : index
    %3 = vector.load %arg3[%c0_4, %c0_5] : memref<1x32xf32, #tpu.memory_space<vmem>>, vector<1x32xf32>
    %cst = arith.constant dense<0.000000e+00> : vector<4xf32>
    %4 = vector.multi_reduction <add>, %1, %cst [1] : vector<4x32xf32> to vector<4xf32>
    %5 = vector.shape_cast %4 : vector<4xf32> to vector<4x1xf32>
    %cst_6 = arith.constant 3.200000e+01 : f32
    %6 = vector.broadcast %cst_6 : f32 to vector<4x1xf32>
    %7 = arith.divf %5, %6 : vector<4x1xf32>
    %8 = vector.broadcast %7 : vector<4x1xf32> to vector<4x32xf32>
    %9 = arith.subf %1, %8 : vector<4x32xf32>
    %10 = arith.mulf %9, %9 : vector<4x32xf32>
    %cst_7 = arith.constant dense<0.000000e+00> : vector<4xf32>
    %11 = vector.multi_reduction <add>, %10, %cst_7 [1] : vector<4x32xf32> to vector<4xf32>
    %12 = vector.shape_cast %11 : vector<4xf32> to vector<4x1xf32>
    %cst_8 = arith.constant 3.200000e+01 : f32
    %13 = vector.broadcast %cst_8 : f32 to vector<4x1xf32>
    %14 = arith.divf %12, %13 : vector<4x1xf32>
    %15 = vector.broadcast %7 : vector<4x1xf32> to vector<4x32xf32>
    %16 = arith.subf %1, %15 : vector<4x32xf32>
    %cst_9 = arith.constant 9.99999997E-7 : f32
    %17 = vector.broadcast %cst_9 : f32 to vector<4x1xf32>
    %18 = arith.addf %14, %17 : vector<4x1xf32>
    %19 = math.rsqrt %18 : vector<4x1xf32>
    %20 = vector.broadcast %19 : vector<4x1xf32> to vector<4x32xf32>
    %21 = arith.mulf %16, %20 : vector<4x32xf32>
    %22 = vector.broadcast %2 : vector<1x32xf32> to vector<4x32xf32>
    %23 = arith.mulf %21, %22 : vector<4x32xf32>
    %24 = vector.broadcast %3 : vector<1x32xf32> to vector<4x32xf32>
    %25 = arith.addf %23, %24 : vector<4x32xf32>
    %26 = arith.truncf %25 : vector<4x32xf32> to vector<4x32xbf16>
    %c0_10 = arith.constant 0 : index
    %c0_11 = arith.constant 0 : index
    %27 = vector.load %arg4[%c0_10, %c0_11] : memref<32x96xbf16, #tpu.memory_space<vmem>>, vector<32x96xbf16>
    %cst_12 = arith.constant dense<0.000000e+00> : vector<4x96xf32>
    %28 = tpu.matmul %26, %27, %cst_12 {dimension_numbers = #tpu.dot_dimension_numbers<[1], [0], [0], [1], [0, 0, 1, 1], [], []>} : vector<4x32xbf16>, vector<32x96xbf16>, vector<4x96xf32> -> vector<4x96xf32>
    %c0_13 = arith.constant 0 : index
    %c0_14 = arith.constant 0 : index
    %29 = vector.load %arg5[%c0_13, %c0_14] : memref<1x96xf32, #tpu.memory_space<vmem>>, vector<1x96xf32>
    %30 = vector.broadcast %29 : vector<1x96xf32> to vector<4x96xf32>
    %31 = arith.addf %28, %30 : vector<4x96xf32>
    %32 = vector.extract_strided_slice %31 {offsets = [0, 0], sizes = [4, 16], strides = [1, 1]} : vector<4x96xf32> to vector<4x16xf32>
    %33 = arith.truncf %32 : vector<4x16xf32> to vector<4x16xbf16>
    %34 = vector.extract_strided_slice %31 {offsets = [0, 32], sizes = [4, 16], strides = [1, 1]} : vector<4x96xf32> to vector<4x16xf32>
    %35 = arith.truncf %34 : vector<4x16xf32> to vector<4x16xbf16>
    %36 = vector.extract_strided_slice %31 {offsets = [0, 64], sizes = [4, 16], strides = [1, 1]} : vector<4x96xf32> to vector<4x16xf32>
    %37 = arith.truncf %36 : vector<4x16xf32> to vector<4x16xbf16>
    %cst_15 = arith.constant dense<0.000000e+00> : vector<4x4xf32>
    %38 = tpu.matmul %33, %35, %cst_15 {dimension_numbers = #tpu.dot_dimension_numbers<[1], [1], [0], [0], [0, 0, 1, 0], [], []>} : vector<4x16xbf16>, vector<4x16xbf16>, vector<4x4xf32> -> vector<4x4xf32>
    %cst_16 = arith.constant 2.500000e-01 : f32
    %39 = vector.broadcast %cst_16 : f32 to vector<4x4xf32>
    %40 = arith.mulf %38, %39 : vector<4x4xf32>
    %cst_17 = arith.constant dense<0xFF800000> : vector<4xf32>
    %41 = vector.multi_reduction <maximumf>, %40, %cst_17 [1] : vector<4x4xf32> to vector<4xf32>
    %42 = vector.shape_cast %41 : vector<4xf32> to vector<4x1xf32>
    %43 = vector.broadcast %42 : vector<4x1xf32> to vector<4x4xf32>
    %44 = arith.subf %40, %43 : vector<4x4xf32>
    %45 = math.exp %44 : vector<4x4xf32>
    %cst_18 = arith.constant dense<0.000000e+00> : vector<4xf32>
    %46 = vector.multi_reduction <add>, %45, %cst_18 [1] : vector<4x4xf32> to vector<4xf32>
    %47 = vector.shape_cast %46 : vector<4xf32> to vector<4x1xf32>
    %48 = tpu.reciprocal %47 {approx = true} : vector<4x1xf32> -> vector<4x1xf32>
    %49 = vector.broadcast %48 : vector<4x1xf32> to vector<4x4xf32>
    %50 = arith.mulf %45, %49 : vector<4x4xf32>
    %51 = arith.truncf %50 : vector<4x4xf32> to vector<4x4xbf16>
    %cst_19 = arith.constant dense<0.000000e+00> : vector<4x16xf32>
    %52 = tpu.matmul %51, %37, %cst_19 {dimension_numbers = #tpu.dot_dimension_numbers<[1], [0], [0], [1], [0, 0, 1, 1], [], []>} : vector<4x4xbf16>, vector<4x16xbf16>, vector<4x16xf32> -> vector<4x16xf32>
    %53 = vector.extract_strided_slice %31 {offsets = [0, 16], sizes = [4, 16], strides = [1, 1]} : vector<4x96xf32> to vector<4x16xf32>
    %54 = arith.truncf %53 : vector<4x16xf32> to vector<4x16xbf16>
    %55 = vector.extract_strided_slice %31 {offsets = [0, 48], sizes = [4, 16], strides = [1, 1]} : vector<4x96xf32> to vector<4x16xf32>
    %56 = arith.truncf %55 : vector<4x16xf32> to vector<4x16xbf16>
    %57 = vector.extract_strided_slice %31 {offsets = [0, 80], sizes = [4, 16], strides = [1, 1]} : vector<4x96xf32> to vector<4x16xf32>
    %58 = arith.truncf %57 : vector<4x16xf32> to vector<4x16xbf16>
    %cst_20 = arith.constant dense<0.000000e+00> : vector<4x4xf32>
    %59 = tpu.matmul %54, %56, %cst_20 {dimension_numbers = #tpu.dot_dimension_numbers<[1], [1], [0], [0], [0, 0, 1, 0], [], []>} : vector<4x16xbf16>, vector<4x16xbf16>, vector<4x4xf32> -> vector<4x4xf32>
    %cst_21 = arith.constant 2.500000e-01 : f32
    %60 = vector.broadcast %cst_21 : f32 to vector<4x4xf32>
    %61 = arith.mulf %59, %60 : vector<4x4xf32>
    %cst_22 = arith.constant dense<0xFF800000> : vector<4xf32>
    %62 = vector.multi_reduction <maximumf>, %61, %cst_22 [1] : vector<4x4xf32> to vector<4xf32>
    %63 = vector.shape_cast %62 : vector<4xf32> to vector<4x1xf32>
    %64 = vector.broadcast %63 : vector<4x1xf32> to vector<4x4xf32>
    %65 = arith.subf %61, %64 : vector<4x4xf32>
    %66 = math.exp %65 : vector<4x4xf32>
    %cst_23 = arith.constant dense<0.000000e+00> : vector<4xf32>
    %67 = vector.multi_reduction <add>, %66, %cst_23 [1] : vector<4x4xf32> to vector<4xf32>
    %68 = vector.shape_cast %67 : vector<4xf32> to vector<4x1xf32>
    %69 = tpu.reciprocal %68 {approx = true} : vector<4x1xf32> -> vector<4x1xf32>
    %70 = vector.broadcast %69 : vector<4x1xf32> to vector<4x4xf32>
    %71 = arith.mulf %66, %70 : vector<4x4xf32>
    %72 = arith.truncf %71 : vector<4x4xf32> to vector<4x4xbf16>
    %cst_24 = arith.constant dense<0.000000e+00> : vector<4x16xf32>
    %73 = tpu.matmul %72, %58, %cst_24 {dimension_numbers = #tpu.dot_dimension_numbers<[1], [0], [0], [1], [0, 0, 1, 1], [], []>} : vector<4x4xbf16>, vector<4x16xbf16>, vector<4x16xf32> -> vector<4x16xf32>
    %74 = tpu.concatenate %52, %73 in 1 : vector<4x16xf32>, vector<4x16xf32> -> vector<4x32xf32>
    %75 = arith.truncf %74 : vector<4x32xf32> to vector<4x32xbf16>
    %c0_25 = arith.constant 0 : index
    %c0_26 = arith.constant 0 : index
    %76 = vector.load %arg6[%c0_25, %c0_26] : memref<32x32xbf16, #tpu.memory_space<vmem>>, vector<32x32xbf16>
    %cst_27 = arith.constant dense<0.000000e+00> : vector<4x32xf32>
    %77 = tpu.matmul %75, %76, %cst_27 {dimension_numbers = #tpu.dot_dimension_numbers<[1], [0], [0], [1], [0, 0, 1, 1], [], []>} : vector<4x32xbf16>, vector<32x32xbf16>, vector<4x32xf32> -> vector<4x32xf32>
    %c0_28 = arith.constant 0 : index
    %c0_29 = arith.constant 0 : index
    %78 = vector.load %arg7[%c0_28, %c0_29] : memref<1x32xf32, #tpu.memory_space<vmem>>, vector<1x32xf32>
    %79 = vector.broadcast %78 : vector<1x32xf32> to vector<4x32xf32>
    %80 = arith.addf %77, %79 : vector<4x32xf32>
    %81 = arith.addf %1, %80 : vector<4x32xf32>
    %c0_30 = arith.constant 0 : index
    %c0_31 = arith.constant 0 : index
    %82 = vector.load %arg8[%c0_30, %c0_31] : memref<1x32xf32, #tpu.memory_space<vmem>>, vector<1x32xf32>
    %c0_32 = arith.constant 0 : index
    %c0_33 = arith.constant 0 : index
    %83 = vector.load %arg9[%c0_32, %c0_33] : memref<1x32xf32, #tpu.memory_space<vmem>>, vector<1x32xf32>
    %cst_34 = arith.constant dense<0.000000e+00> : vector<4xf32>
    %84 = vector.multi_reduction <add>, %81, %cst_34 [1] : vector<4x32xf32> to vector<4xf32>
    %85 = vector.shape_cast %84 : vector<4xf32> to vector<4x1xf32>
    %cst_35 = arith.constant 3.200000e+01 : f32
    %86 = vector.broadcast %cst_35 : f32 to vector<4x1xf32>
    %87 = arith.divf %85, %86 : vector<4x1xf32>
    %88 = vector.broadcast %87 : vector<4x1xf32> to vector<4x32xf32>
    %89 = arith.subf %81, %88 : vector<4x32xf32>
    %90 = arith.mulf %89, %89 : vector<4x32xf32>
    %cst_36 = arith.constant dense<0.000000e+00> : vector<4xf32>
    %91 = vector.multi_reduction <add>, %90, %cst_36 [1] : vector<4x32xf32> to vector<4xf32>
    %92 = vector.shape_cast %91 : vector<4xf32> to vector<4x1xf32>
    %cst_37 = arith.constant 3.200000e+01 : f32
    %93 = vector.broadcast %cst_37 : f32 to vector<4x1xf32>
    %94 = arith.divf %92, %93 : vector<4x1xf32>
    %95 = vector.broadcast %87 : vector<4x1xf32> to vector<4x32xf32>
    %96 = arith.subf %81, %95 : vector<4x32xf32>
    %cst_38 = arith.constant 9.99999997E-7 : f32
    %97 = vector.broadcast %cst_38 : f32 to vector<4x1xf32>
    %98 = arith.addf %94, %97 : vector<4x1xf32>
    %99 = math.rsqrt %98 : vector<4x1xf32>
    %100 = vector.broadcast %99 : vector<4x1xf32> to vector<4x32xf32>
    %101 = arith.mulf %96, %100 : vector<4x32xf32>
    %102 = vector.broadcast %82 : vector<1x32xf32> to vector<4x32xf32>
    %103 = arith.mulf %101, %102 : vector<4x32xf32>
    %104 = vector.broadcast %83 : vector<1x32xf32> to vector<4x32xf32>
    %105 = arith.addf %103, %104 : vector<4x32xf32>
    %106 = arith.truncf %105 : vector<4x32xf32> to vector<4x32xbf16>
    %c0_39 = arith.constant 0 : index
    %c0_40 = arith.constant 0 : index
    %107 = vector.load %arg10[%c0_39, %c0_40] : memref<32x64xbf16, #tpu.memory_space<vmem>>, vector<32x64xbf16>
    %cst_41 = arith.constant dense<0.000000e+00> : vector<4x64xf32>
    %108 = tpu.matmul %106, %107, %cst_41 {dimension_numbers = #tpu.dot_dimension_numbers<[1], [0], [0], [1], [0, 0, 1, 1], [], []>} : vector<4x32xbf16>, vector<32x64xbf16>, vector<4x64xf32> -> vector<4x64xf32>
    %c0_42 = arith.constant 0 : index
    %c0_43 = arith.constant 0 : index
    %109 = vector.load %arg11[%c0_42, %c0_43] : memref<1x64xf32, #tpu.memory_space<vmem>>, vector<1x64xf32>
    %110 = vector.broadcast %109 : vector<1x64xf32> to vector<4x64xf32>
    %111 = arith.addf %108, %110 : vector<4x64xf32>
    %112 = arith.mulf %111, %111 : vector<4x64xf32>
    %113 = arith.mulf %111, %112 : vector<4x64xf32>
    %cst_44 = arith.constant 4.471500e-02 : f32
    %114 = vector.broadcast %cst_44 : f32 to vector<4x64xf32>
    %115 = arith.mulf %114, %113 : vector<4x64xf32>
    %116 = arith.addf %111, %115 : vector<4x64xf32>
    %cst_45 = arith.constant 0.797884583 : f32
    %117 = vector.broadcast %cst_45 : f32 to vector<4x64xf32>
    %118 = arith.mulf %117, %116 : vector<4x64xf32>
    %119 = math.tanh %118 : vector<4x64xf32>
    %cst_46 = arith.constant 1.000000e+00 : f32
    %120 = vector.broadcast %cst_46 : f32 to vector<4x64xf32>
    %121 = arith.addf %120, %119 : vector<4x64xf32>
    %cst_47 = arith.constant 5.000000e-01 : f32
    %122 = vector.broadcast %cst_47 : f32 to vector<4x64xf32>
    %123 = arith.mulf %122, %121 : vector<4x64xf32>
    %124 = arith.mulf %111, %123 : vector<4x64xf32>
    %125 = arith.truncf %124 : vector<4x64xf32> to vector<4x64xbf16>
    %c0_48 = arith.constant 0 : index
    %c0_49 = arith.constant 0 : index
    %126 = vector.load %arg12[%c0_48, %c0_49] : memref<64x32xbf16, #tpu.memory_space<vmem>>, vector<64x32xbf16>
    %cst_50 = arith.constant dense<0.000000e+00> : vector<4x32xf32>
    %127 = tpu.matmul %125, %126, %cst_50 {dimension_numbers = #tpu.dot_dimension_numbers<[1], [0], [0], [1], [0, 0, 1, 1], [], []>} : vector<4x64xbf16>, vector<64x32xbf16>, vector<4x32xf32> -> vector<4x32xf32>
    %c0_51 = arith.constant 0 : index
    %c0_52 = arith.constant 0 : index
    %128 = vector.load %arg13[%c0_51, %c0_52] : memref<1x32xf32, #tpu.memory_space<vmem>>, vector<1x32xf32>
    %129 = vector.broadcast %128 : vector<1x32xf32> to vector<4x32xf32>
    %130 = arith.addf %127, %129 : vector<4x32xf32>
    %131 = arith.addf %81, %130 : vector<4x32xf32>
    %c0_53 = arith.constant 0 : index
    %c0_54 = arith.constant 0 : index
    %c0_55 = arith.constant 0 : index
    %132 = vector.load %arg14[%c0_53, %c0_54, %c0_55] : memref<1x4x32xf32, #tpu.memory_space<vmem>>, vector<1x4x32xf32>
    %133 = vector.shape_cast %132 : vector<1x4x32xf32> to vector<4x32xf32>
    %134 = vector.shape_cast %131 : vector<4x32xf32> to vector<1x4x32xf32>
    tpu.vector_store %arg14[%c0_53, %c0_54, %c0_55], %134 {strides = array<i32>} : memref<1x4x32xf32, #tpu.memory_space<vmem>>, vector<1x4x32xf32>,
    return
  }
  func.func @transform_0(%arg0: i32) -> (i32, i32, i32) {
    %c0_i32 = arith.constant 0 : i32
    %c0_i32_0 = arith.constant 0 : i32
    %c0_i32_1 = arith.constant 0 : i32
    return %arg0, %c0_i32, %c0_i32_0 : i32, i32, i32
  }
  func.func @transform_1(%arg0: i32) -> (i32, i32) {
    %c0_i32 = arith.constant 0 : i32
    %c0_i32_0 = arith.constant 0 : i32
    %c0_i32_1 = arith.constant 0 : i32
    return %c0_i32, %c0_i32_0 : i32, i32
  }
  func.func @transform_2(%arg0: i32) -> (i32, i32) {
    %c0_i32 = arith.constant 0 : i32
    %c0_i32_0 = arith.constant 0 : i32
    %c0_i32_1 = arith.constant 0 : i32
    return %c0_i32, %c0_i32_0 : i32, i32
  }
  func.func @transform_3(%arg0: i32) -> (i32, i32) {
    %c0_i32 = arith.constant 0 : i32
    %c0_i32_0 = arith.constant 0 : i32
    %c0_i32_1 = arith.constant 0 : i32
    return %c0_i32, %c0_i32_0 : i32, i32
  }
  func.func @transform_4(%arg0: i32) -> (i32, i32) {
    %c0_i32 = arith.constant 0 : i32
    %c0_i32_0 = arith.constant 0 : i32
    %c0_i32_1 = arith.constant 0 : i32
    return %c0_i32, %c0_i32_0 : i32, i32
  }
  func.func @transform_5(%arg0: i32) -> (i32, i32) {
    %c0_i32 = arith.constant 0 : i32
    %c0_i32_0 = arith.constant 0 : i32
    %c0_i32_1 = arith.constant 0 : i32
    return %c0_i32, %c0_i32_0 : i32, i32
  }
  func.func @transform_6(%arg0: i32) -> (i32, i32) {
    %c0_i32 = arith.constant 0 : i32
    %c0_i32_0 = arith.constant 0 : i32
    %c0_i32_1 = arith.constant 0 : i32
    return %c0_i32, %c0_i32_0 : i32, i32
  }
  func.func @transform_7(%arg0: i32) -> (i32, i32) {
    %c0_i32 = arith.constant 0 : i32
    %c0_i32_0 = arith.constant 0 : i32
    %c0_i32_1 = arith.constant 0 : i32
    return %c0_i32, %c0_i32_0 : i32, i32
  }
  func.func @transform_8(%arg0: i32) -> (i32, i32) {
    %c0_i32 = arith.constant 0 : i32
    %c0_i32_0 = arith.constant 0 : i32
    %c0_i32_1 = arith.constant 0 : i32
    return %c0_i32, %c0_i32_0 : i32, i32
  }
  func.func @transform_9(%arg0: i32) -> (i32, i32) {
    %c0_i32 = arith.constant 0 : i32
    %c0_i32_0 = arith.constant 0 : i32
    %c0_i32_1 = arith.constant 0 : i32
    return %c0_i32, %c0_i32_0 : i32, i32
  }
  func.func @transform_10(%arg0: i32) -> (i32, i32) {
    %c0_i32 = arith.constant 0 : i32
    %c0_i32_0 = arith.constant 0 : i32
    %c0_i32_1 = arith.constant 0 : i32
    return %c0_i32, %c0_i32_0 : i32, i32
  }
  func.func @transform_11(%arg0: i32) -> (i32, i32) {
    %c0_i32 = arith.constant 0 : i32
    %c0_i32_0 = arith.constant 0 : i32
    %c0_i32_1 = arith.constant 0 : i32
    return %c0_i32, %c0_i32_0 : i32, i32
  }
  func.func @transform_12(%arg0: i32) -> (i32, i32) {
    %c0_i32 = arith.constant 0 : i32
    %c0_i32_0 = arith.constant 0 : i32
    %c0_i32_1 = arith.constant 0 : i32
    return %c0_i32, %c0_i32_0 : i32, i32
  }
  func.func @transform_13(%arg0: i32) -> (i32, i32, i32) {
    %c0_i32 = arith.constant 0 : i32
    %c0_i32_0 = arith.constant 0 : i32
    %c0_i32_1 = arith.constant 0 : i32
    return %arg0, %c0_i32, %c0_i32_0 : i32, i32, i32
  }
}

module attributes {stable_mosaic.version = 11 : i64} {
  func.func @_bottleneck_kernel(%arg0: i32, %arg1: memref<1x4x32xf32, #tpu.memory_space<vmem>>, %arg2: memref<1x32xf32, #tpu.memory_space<vmem>>, %arg3: memref<1x32xf32, #tpu.memory_space<vmem>>, %arg4: memref<32x32xbf16, #tpu.memory_space<vmem>>, %arg5: memref<1x32xf32, #tpu.memory_space<vmem>>, %arg6: memref<64x32xf32, #tpu.memory_space<vmem>>, %arg7: memref<32x32xbf16, #tpu.memory_space<vmem>>, %arg8: memref<1x32xf32, #tpu.memory_space<vmem>>, %arg9: memref<4x32xf32, #tpu.memory_space<vmem>>, %arg10: memref<1x4x32xf32, #tpu.memory_space<vmem>>, %arg11: memref<1x8x128xf32, #tpu.memory_space<vmem>>) attributes {dimension_semantics = [#tpu.dimension_semantics<parallel>], iteration_bounds = array<i64: 2>, scalar_prefetch = 0 : i64, scratch_operands = 0 : i64, tpu.core_type = #tpu.core_type<tc>, window_params = [{transform_indices = @transform_0, window_bounds = array<i64: 1, 4, 32>}, {pipeline_mode = #tpu.pipeline_mode<synchronous>, transform_indices = @transform_1, window_bounds = array<i64: 1, 32>}, {pipeline_mode = #tpu.pipeline_mode<synchronous>, transform_indices = @transform_2, window_bounds = array<i64: 1, 32>}, {pipeline_mode = #tpu.pipeline_mode<synchronous>, transform_indices = @transform_3, window_bounds = array<i64: 32, 32>}, {pipeline_mode = #tpu.pipeline_mode<synchronous>, transform_indices = @transform_4, window_bounds = array<i64: 1, 32>}, {pipeline_mode = #tpu.pipeline_mode<synchronous>, transform_indices = @transform_5, window_bounds = array<i64: 64, 32>}, {pipeline_mode = #tpu.pipeline_mode<synchronous>, transform_indices = @transform_6, window_bounds = array<i64: 32, 32>}, {pipeline_mode = #tpu.pipeline_mode<synchronous>, transform_indices = @transform_7, window_bounds = array<i64: 1, 32>}, {pipeline_mode = #tpu.pipeline_mode<synchronous>, transform_indices = @transform_8, window_bounds = array<i64: 4, 32>}, {transform_indices = @transform_9, window_bounds = array<i64: 1, 4, 32>}, {transform_indices = @transform_10, window_bounds = array<i64: 1, 8, 128>}]} {
    %c0 = arith.constant 0 : index
    %c0_0 = arith.constant 0 : index
    %c0_1 = arith.constant 0 : index
    %0 = vector.load %arg1[%c0, %c0_0, %c0_1] : memref<1x4x32xf32, #tpu.memory_space<vmem>>, vector<1x4x32xf32>
    %1 = vector.shape_cast %0 : vector<1x4x32xf32> to vector<4x32xf32>
    %c0_2 = arith.constant 0 : index
    %c0_3 = arith.constant 0 : index
    %2 = vector.load %arg2[%c0_2, %c0_3] : memref<1x32xf32, #tpu.memory_space<vmem>>, vector<1x32xf32>
    %c0_4 = arith.constant 0 : index
    %c0_5 = arith.constant 0 : index
    %3 = vector.load %arg3[%c0_4, %c0_5] : memref<1x32xf32, #tpu.memory_space<vmem>>, vector<1x32xf32>
    %cst = arith.constant dense<0.000000e+00> : vector<4xf32>
    %4 = vector.multi_reduction <add>, %1, %cst [1] : vector<4x32xf32> to vector<4xf32>
    %5 = vector.shape_cast %4 : vector<4xf32> to vector<4x1xf32>
    %cst_6 = arith.constant 3.200000e+01 : f32
    %6 = vector.broadcast %cst_6 : f32 to vector<4x1xf32>
    %7 = arith.divf %5, %6 : vector<4x1xf32>
    %8 = vector.broadcast %7 : vector<4x1xf32> to vector<4x32xf32>
    %9 = arith.subf %1, %8 : vector<4x32xf32>
    %10 = arith.mulf %9, %9 : vector<4x32xf32>
    %cst_7 = arith.constant dense<0.000000e+00> : vector<4xf32>
    %11 = vector.multi_reduction <add>, %10, %cst_7 [1] : vector<4x32xf32> to vector<4xf32>
    %12 = vector.shape_cast %11 : vector<4xf32> to vector<4x1xf32>
    %cst_8 = arith.constant 3.200000e+01 : f32
    %13 = vector.broadcast %cst_8 : f32 to vector<4x1xf32>
    %14 = arith.divf %12, %13 : vector<4x1xf32>
    %15 = vector.broadcast %7 : vector<4x1xf32> to vector<4x32xf32>
    %16 = arith.subf %1, %15 : vector<4x32xf32>
    %cst_9 = arith.constant 9.99999997E-7 : f32
    %17 = vector.broadcast %cst_9 : f32 to vector<4x1xf32>
    %18 = arith.addf %14, %17 : vector<4x1xf32>
    %19 = math.rsqrt %18 : vector<4x1xf32>
    %20 = vector.broadcast %19 : vector<4x1xf32> to vector<4x32xf32>
    %21 = arith.mulf %16, %20 : vector<4x32xf32>
    %22 = vector.broadcast %2 : vector<1x32xf32> to vector<4x32xf32>
    %23 = arith.mulf %21, %22 : vector<4x32xf32>
    %24 = vector.broadcast %3 : vector<1x32xf32> to vector<4x32xf32>
    %25 = arith.addf %23, %24 : vector<4x32xf32>
    %26 = arith.truncf %25 : vector<4x32xf32> to vector<4x32xbf16>
    %c0_10 = arith.constant 0 : index
    %c0_11 = arith.constant 0 : index
    %27 = vector.load %arg4[%c0_10, %c0_11] : memref<32x32xbf16, #tpu.memory_space<vmem>>, vector<32x32xbf16>
    %cst_12 = arith.constant dense<0.000000e+00> : vector<4x32xf32>
    %28 = tpu.matmul %26, %27, %cst_12 {dimension_numbers = #tpu.dot_dimension_numbers<[1], [0], [0], [1], [0, 0, 1, 1], [], []>} : vector<4x32xbf16>, vector<32x32xbf16>, vector<4x32xf32> -> vector<4x32xf32>
    %c0_13 = arith.constant 0 : index
    %c0_14 = arith.constant 0 : index
    %29 = vector.load %arg5[%c0_13, %c0_14] : memref<1x32xf32, #tpu.memory_space<vmem>>, vector<1x32xf32>
    %30 = vector.broadcast %29 : vector<1x32xf32> to vector<4x32xf32>
    %31 = arith.addf %28, %30 : vector<4x32xf32>
    %32 = arith.mulf %31, %31 : vector<4x32xf32>
    %cst_15 = arith.constant dense<0.000000e+00> : vector<4xf32>
    %33 = vector.multi_reduction <add>, %32, %cst_15 [1] : vector<4x32xf32> to vector<4xf32>
    %34 = vector.shape_cast %33 : vector<4xf32> to vector<4x1xf32>
    %cst_16 = arith.constant 9.99999996E-13 : f32
    %35 = vector.broadcast %cst_16 : f32 to vector<4x1xf32>
    %36 = arith.addf %34, %35 : vector<4x1xf32>
    %37 = math.rsqrt %36 : vector<4x1xf32>
    %38 = vector.broadcast %37 : vector<4x1xf32> to vector<4x32xf32>
    %39 = arith.mulf %31, %38 : vector<4x32xf32>
    %c0_17 = arith.constant 0 : index
    %c0_18 = arith.constant 0 : index
    %40 = vector.load %arg6[%c0_17, %c0_18] : memref<64x32xf32, #tpu.memory_space<vmem>>, vector<64x32xf32>
    %41 = arith.mulf %40, %40 : vector<64x32xf32>
    %cst_19 = arith.constant dense<0.000000e+00> : vector<64xf32>
    %42 = vector.multi_reduction <add>, %41, %cst_19 [1] : vector<64x32xf32> to vector<64xf32>
    %43 = vector.shape_cast %42 : vector<64xf32> to vector<64x1xf32>
    %cst_20 = arith.constant 9.99999996E-13 : f32
    %44 = vector.broadcast %cst_20 : f32 to vector<64x1xf32>
    %45 = arith.addf %43, %44 : vector<64x1xf32>
    %46 = math.rsqrt %45 : vector<64x1xf32>
    %47 = vector.broadcast %46 : vector<64x1xf32> to vector<64x32xf32>
    %48 = arith.mulf %40, %47 : vector<64x32xf32>
    %cst_21 = arith.constant dense<0.000000e+00> : vector<4x64xf32>
    %49 = tpu.matmul %39, %48, %cst_21 {dimension_numbers = #tpu.dot_dimension_numbers<[1], [1], [0], [0], [0, 0, 1, 0], [], []>} : vector<4x32xf32>, vector<64x32xf32>, vector<4x64xf32> -> vector<4x64xf32>
    %cst_22 = arith.constant dense<0xFF800000> : vector<4xf32>
    %50 = vector.multi_reduction <maximumf>, %49, %cst_22 [1] : vector<4x64xf32> to vector<4xf32>
    %51 = vector.shape_cast %50 : vector<4xf32> to vector<4x1xf32>
    %52 = tpu.iota {dimensions = array<i32: 1>} : vector<4x64xi32>
    %53 = vector.broadcast %51 : vector<4x1xf32> to vector<4x64xf32>
    %54 = arith.cmpf oeq, %49, %53 : vector<4x64xf32>
    %c64_i32 = arith.constant 64 : i32
    %55 = vector.broadcast %c64_i32 : i32 to vector<4x64xi32>
    %56 = arith.select %54, %52, %55 : vector<4x64xi1>, vector<4x64xi32>
    %cst_23 = arith.constant dense<2147483647> : vector<4xi32>
    %57 = vector.multi_reduction <minsi>, %56, %cst_23 [1] : vector<4x64xi32> to vector<4xi32>
    %58 = vector.shape_cast %57 : vector<4xi32> to vector<4x1xi32>
    %59 = vector.broadcast %58 : vector<4x1xi32> to vector<4x64xi32>
    %60 = arith.cmpi eq, %52, %59 : vector<4x64xi32>
    %61 = arith.extui %60 : vector<4x64xi1> to vector<4x64xi32>
    %62 = arith.sitofp %61 : vector<4x64xi32> to vector<4x64xf32>
    %cst_24 = arith.constant dense<0.000000e+00> : vector<4x32xf32>
    %63 = tpu.matmul %62, %48, %cst_24 {dimension_numbers = #tpu.dot_dimension_numbers<[1], [0], [0], [1], [0, 0, 1, 1], [], []>} : vector<4x64xf32>, vector<64x32xf32>, vector<4x32xf32> -> vector<4x32xf32>
    %64 = arith.subf %63, %31 : vector<4x32xf32>
    %65 = arith.mulf %64, %64 : vector<4x32xf32>
    %66 = vector.shape_cast %65 : vector<4x32xf32> to vector<1x4x32xf32>
    %cst_25 = arith.constant dense<0.000000e+00> : vector<1xf32>
    %67 = vector.multi_reduction <add>, %66, %cst_25 [1, 2] : vector<1x4x32xf32> to vector<1xf32>
    %68 = vector.shape_cast %67 : vector<1xf32> to vector<1x1x1xf32>
    %69 = vector.extract %68[0, 0, 0] : f32 from vector<1x1x1xf32>
    %cst_26 = arith.constant 3.906250e-03 : f32
    %70 = arith.mulf %69, %cst_26 : f32
    %71 = vector.broadcast %70 : f32 to vector<8x128xf32>
    %c0_27 = arith.constant 0 : index
    %c0_28 = arith.constant 0 : index
    %c0_29 = arith.constant 0 : index
    %72 = vector.load %arg11[%c0_27, %c0_28, %c0_29] : memref<1x8x128xf32, #tpu.memory_space<vmem>>, vector<1x8x128xf32>
    %73 = vector.shape_cast %72 : vector<1x8x128xf32> to vector<8x128xf32>
    %74 = vector.shape_cast %71 : vector<8x128xf32> to vector<1x8x128xf32>
    tpu.vector_store %arg11[%c0_27, %c0_28, %c0_29], %74 {strides = array<i32>} : memref<1x8x128xf32, #tpu.memory_space<vmem>>, vector<1x8x128xf32>,
    %75 = arith.truncf %63 : vector<4x32xf32> to vector<4x32xbf16>
    %c0_30 = arith.constant 0 : index
    %c0_31 = arith.constant 0 : index
    %76 = vector.load %arg7[%c0_30, %c0_31] : memref<32x32xbf16, #tpu.memory_space<vmem>>, vector<32x32xbf16>
    %cst_32 = arith.constant dense<0.000000e+00> : vector<4x32xf32>
    %77 = tpu.matmul %75, %76, %cst_32 {dimension_numbers = #tpu.dot_dimension_numbers<[1], [0], [0], [1], [0, 0, 1, 1], [], []>} : vector<4x32xbf16>, vector<32x32xbf16>, vector<4x32xf32> -> vector<4x32xf32>
    %c0_33 = arith.constant 0 : index
    %c0_34 = arith.constant 0 : index
    %78 = vector.load %arg8[%c0_33, %c0_34] : memref<1x32xf32, #tpu.memory_space<vmem>>, vector<1x32xf32>
    %79 = vector.broadcast %78 : vector<1x32xf32> to vector<4x32xf32>
    %80 = arith.addf %77, %79 : vector<4x32xf32>
    %c0_35 = arith.constant 0 : index
    %c0_36 = arith.constant 0 : index
    %81 = vector.load %arg9[%c0_35, %c0_36] : memref<4x32xf32, #tpu.memory_space<vmem>>, vector<4x32xf32>
    %82 = arith.addf %80, %81 : vector<4x32xf32>
    %c0_37 = arith.constant 0 : index
    %c0_38 = arith.constant 0 : index
    %c0_39 = arith.constant 0 : index
    %83 = vector.load %arg10[%c0_37, %c0_38, %c0_39] : memref<1x4x32xf32, #tpu.memory_space<vmem>>, vector<1x4x32xf32>
    %84 = vector.shape_cast %83 : vector<1x4x32xf32> to vector<4x32xf32>
    %85 = vector.shape_cast %82 : vector<4x32xf32> to vector<1x4x32xf32>
    tpu.vector_store %arg10[%c0_37, %c0_38, %c0_39], %85 {strides = array<i32>} : memref<1x4x32xf32, #tpu.memory_space<vmem>>, vector<1x4x32xf32>,
    return
  }
  func.func @transform_0(%arg0: i32) -> (i32, i32, i32) {
    %c0_i32 = arith.constant 0 : i32
    %c0_i32_0 = arith.constant 0 : i32
    %c0_i32_1 = arith.constant 0 : i32
    return %arg0, %c0_i32, %c0_i32_0 : i32, i32, i32
  }
  func.func @transform_1(%arg0: i32) -> (i32, i32) {
    %c0_i32 = arith.constant 0 : i32
    %c0_i32_0 = arith.constant 0 : i32
    %c0_i32_1 = arith.constant 0 : i32
    return %c0_i32, %c0_i32_0 : i32, i32
  }
  func.func @transform_2(%arg0: i32) -> (i32, i32) {
    %c0_i32 = arith.constant 0 : i32
    %c0_i32_0 = arith.constant 0 : i32
    %c0_i32_1 = arith.constant 0 : i32
    return %c0_i32, %c0_i32_0 : i32, i32
  }
  func.func @transform_3(%arg0: i32) -> (i32, i32) {
    %c0_i32 = arith.constant 0 : i32
    %c0_i32_0 = arith.constant 0 : i32
    %c0_i32_1 = arith.constant 0 : i32
    return %c0_i32, %c0_i32_0 : i32, i32
  }
  func.func @transform_4(%arg0: i32) -> (i32, i32) {
    %c0_i32 = arith.constant 0 : i32
    %c0_i32_0 = arith.constant 0 : i32
    %c0_i32_1 = arith.constant 0 : i32
    return %c0_i32, %c0_i32_0 : i32, i32
  }
  func.func @transform_5(%arg0: i32) -> (i32, i32) {
    %c0_i32 = arith.constant 0 : i32
    %c0_i32_0 = arith.constant 0 : i32
    %c0_i32_1 = arith.constant 0 : i32
    return %c0_i32, %c0_i32_0 : i32, i32
  }
  func.func @transform_6(%arg0: i32) -> (i32, i32) {
    %c0_i32 = arith.constant 0 : i32
    %c0_i32_0 = arith.constant 0 : i32
    %c0_i32_1 = arith.constant 0 : i32
    return %c0_i32, %c0_i32_0 : i32, i32
  }
  func.func @transform_7(%arg0: i32) -> (i32, i32) {
    %c0_i32 = arith.constant 0 : i32
    %c0_i32_0 = arith.constant 0 : i32
    %c0_i32_1 = arith.constant 0 : i32
    return %c0_i32, %c0_i32_0 : i32, i32
  }
  func.func @transform_8(%arg0: i32) -> (i32, i32) {
    %c0_i32 = arith.constant 0 : i32
    %c0_i32_0 = arith.constant 0 : i32
    %c0_i32_1 = arith.constant 0 : i32
    return %c0_i32, %c0_i32_0 : i32, i32
  }
  func.func @transform_9(%arg0: i32) -> (i32, i32, i32) {
    %c0_i32 = arith.constant 0 : i32
    %c0_i32_0 = arith.constant 0 : i32
    %c0_i32_1 = arith.constant 0 : i32
    return %arg0, %c0_i32, %c0_i32_0 : i32, i32, i32
  }
  func.func @transform_10(%arg0: i32) -> (i32, i32, i32) {
    %c0_i32 = arith.constant 0 : i32
    %c0_i32_0 = arith.constant 0 : i32
    %c0_i32_1 = arith.constant 0 : i32
    return %arg0, %c0_i32, %c0_i32_0 : i32, i32, i32
  }
}

</mosaic_0001>

<bundles_post_ra>
// kernel: vqvae_forward.5
= control target key start
LH: loop header
LB: loop body
LE: loop exit
PB: predicated region body
PF: predicated region fallthrough
CT: control target
= control target key end

     0   :  { %s543_s15 = smov 0   ;;  %s618_s0 = inlined_call_operand.vmem [shape: f32[2,4,256], index: 0, kind: input, shape index: {}]   ;;  %s619_s1 = inlined_call_operand.vmem [shape: bf16[256,32], index: 1, kind: input, shape index: {}]   ;;  %s620_s2 = inlined_call_operand.vmem [shape: f32[1,32], index: 2, kind: input, shape index: {}]   ;;  %s621_s3 = inlined_call_operand.vmem [shape: f32[4,32], index: 3, kind: input, shape index: {}]   ;;  %s622_s4 = inlined_call_operand.vmem [shape: f32[2,4,32], index: 4, kind: output, shape index: {}]  }
   0x1 LB: > { %s435_s16 = sadd.s32 4294967295, %s516_s15   ;;  %p439_p0 = scmp.ge.s32.totalorder %s516_s15, 1  ;;  %s516_s15 = sphi %s543_s15, %s14_s15  }
   0x2   : > { %p162_p1 = scmp.lt.s32.totalorder %s516_s15, 3 }
   0x4   : > { %p163_p2 = pnand %p439_p0, %p162_p1 }
   0x5   : > { %p187_p3 = scmp.lt.s32.totalorder (!%p163_p2), %s435_s16, 1 }
   0x6   : > { %166 = sbr.rel (%p163_p2) target bundleno = 246 (0xf6), region = 36 }
   0xb   : > { %v493_v0 = vld [vmem:[%s619_s1 + $0x78] sm:$0xff]   ;;  %v495_v2 = vld [vmem:[%s619_s1 + $0x70] sm:$0xff]   ;;  %v497_v4 = vld [vmem:[%s619_s1 + $0x68] sm:$0xff]   ;;  %s624_s16 = smov (!%p187_p3, %s435_s16), 1  ;;  %vm380_vm0 = vcmask 257024  }
   0xc   : > { %v494_v1 = vld [vmem:[%s619_s1 + $0x38] sm:$0xff]   ;;  %463 = vmatprep.subr.bf16.mxu0 %v493_v0  ;;  %v496_v3 = vld [vmem:[%s619_s1 + $0x30] sm:$0xff]   ;;  %v498_v5 = vld [vmem:[%s619_s1 + $0x28] sm:$0xff]   ;;  %s462_s5 = sshll.u32 %s624_s16, 3 }
   0xd   : > { %464 = vmatpush3.bf16.msra.mxu0 %v494_v1  ;;  %v499_v6 = vld [vmem:[%s619_s1 + $0x60] sm:$0xff]   ;;  %v501_v8 = vld [vmem:[%s619_s1 + $0x58] sm:$0xff]   ;;  %s191_s12 = scalar_lea.vmem %s618_s0, %s462_s5  ;;  %v503_v10 = vld [vmem:[%s619_s1 + $0x50] sm:$0xff]   ;;  %s442_s5 = sshll.u32 %s624_s16, 2 }
   0xe   : > { %465 = vmatprep.subr.bf16.mxu0 %v495_v2  ;;  %v500_v7 = vld [vmem:[%s619_s1 + $0x20] sm:$0xff]   ;;  %v502_v9 = vld [vmem:[%s619_s1 + $0x18] sm:$0xff]   ;;  %v504_v13 = vld [vmem:[%s619_s1 + $0x10] sm:$0xff]   ;;  %s195_s10 = scalar_lea.vmem %s622_s4, %s442_s5 }
   0xf   : > { %v197_v11 = vld [vmem:[%s191_s12] sm:$0xff]  ;;  %v505_v15 = vld [vmem:[%s619_s1 + $0x48] sm:$0xff]  }
  0x10   : > { %v199_v12 = vcombine.high %v197_v11, %v197_v11  ;;  %v506_v16 = vld [vmem:[%s619_s1 + $0x8] sm:$0xff]   ;;  %v507_v17 = vld [vmem:[%s619_s1 + $0x40] sm:$0xff]   ;;  %v201_v19 = vpack.c.bf16 %v197_v11, %v197_v11 }
  0x11   : > { %466 = vmatpush3.bf16.msra.mxu0 %v496_v3  ;;  %v508_v18 = vld [vmem:[%s619_s1] sm:$0xff]  }
  0x12   : > { %467 = vmatprep.subr.bf16.mxu0 %v497_v4  ;;  %v202_v14 = vpack.c.bf16 %v199_v12, %v199_v12  ;;  %v443_v21 = vld [vmem:[%s620_s2] ss:$0 sm:$0xff] }
  0x13   : > { %v378_v24 = vld [vmem:[%s621_s3] sm:$0xf] }
  0x14   : > { %370 = vmatprep.mubr.bf16.mxu0 %v202_v14 }
  0x15   : > { %468 = vmatpush3.bf16.msra.mxu0 %v498_v5 }
  0x16   : > { %469 = vmatprep.subr.bf16.mxu0 %v499_v6 }
  0x19   : > { %470 = vmatpush3.bf16.msra.mxu0 %v500_v7 }
  0x1a   : > { %471 = vmatprep.subr.bf16.mxu0 %v501_v8 }
  0x1d   : > { %472 = vmatpush3.bf16.msra.mxu0 %v502_v9 }
  0x1e   : > { %473 = vmatprep.subr.bf16.mxu0 %v503_v10 }
  0x21   : > { %474 = vmatpush3.bf16.msra.mxu0 %v504_v13 }
  0x22   : > { %475 = vmatprep.subr.bf16.mxu0 %v505_v15 }
  0x25   : > { %476 = vmatpush3.bf16.msra.mxu0 %v506_v16 }
  0x26   : > { %477 = vmatprep.subr.bf16.mxu0 %v507_v17 }
  0x29   : > { %478 = vmatpush3.bf16.msra.mxu0 %v508_v18 }
  0x2c   : > { %371 = vmatmul.mubr.bf16.vlgmr.msra.gmra.mxu0 %v201_v19 }
  0xec   : > { %v479_v20 = vpop.f32.mrf.mxu0 }
  0xee   : > { %v480_v22 = vpop.f32.mrf.mxu0 }
  0xef   : > { %v481_v23 = vadd.f32 %v480_v22, %v479_v20 }
  0xf0   : > { %v482_v25 = vpop.f32.mrf.mxu0 }
  0xf1   : > { %v373_v26 = vadd.f32 %v481_v23, %v443_v21 }
  0xf2   : > { %v483_v27 = vpop.f32.mrf.mxu0 }
  0xf3   : > { %v379_v28 = vadd.f32 %v378_v24, %v373_v26 }
  0xf5   : > { %381 = vst.msk [vmem:[%s195_s10] sm:$0xf] %vm380_vm0, %v379_v28 }
  0xf6 PF: > { %s14_s15 = sadd.s32 1, %s516_s15  }
  0xf7   : > { %p11_p4 = scmp.ge.s32.totalorder %s14_s15, 4  }
  0xf9   :  { %13 = sbr.rel (!%p11_p4) target bundleno = 1 (0x1), region = 66 }

// kernel: vqvae_forward.9
= control target key start
LH: loop header
LB: loop body
LE: loop exit
PB: predicated region body
PF: predicated region fallthrough
CT: control target
= control target key end

     0   :  { %s471_s18 = smov 0   ;;  %s513_s0 = inlined_call_operand.vmem [shape: f32[2,4,32], index: 0, kind: input, shape index: {}]   ;;  %s514_s1 = inlined_call_operand.vmem [shape: f32[1,32], index: 1, kind: input, shape index: {}]   ;;  %s515_s2 = inlined_call_operand.vmem [shape: f32[1,32], index: 2, kind: input, shape index: {}]   ;;  %s516_s3 = inlined_call_operand.vmem [shape: bf16[32,256], index: 3, kind: input, shape index: {}]   ;;  %s517_s4 = inlined_call_operand.vmem [shape: f32[1,256], index: 4, kind: input, shape index: {}]   ;;  %s518_s5 = inlined_call_operand.vmem [shape: f32[2,4,256], index: 5, kind: output, shape index: {}]  }
   0x1 LB: > { %s397_s19 = sadd.s32 4294967295, %s438_s18   ;;  %p401_p0 = scmp.ge.s32.totalorder %s438_s18, 1  ;;  %s438_s18 = sphi %s471_s18, %s15_s18  }
   0x2   : > { %p186_p1 = scmp.lt.s32.totalorder %s438_s18, 3 }
   0x4   : > { %p187_p2 = pnand %p401_p0, %p186_p1 }
   0x5   : > { %p213_p3 = scmp.lt.s32.totalorder (!%p187_p2), %s397_s19, 1 }
   0x6   : > { %190 = sbr.rel (%p187_p2) target bundleno = 525 (0x20d), region = 40 }
   0xb   : > { %s520_s19 = smov (!%p213_p3, %s397_s19), 1  ;;  %vm226_vm0 = vcmask 257024   ;;  %v424_v7 = vld [vmem:[%s516_s3 + $0x14] ss:$8 sps:$4 sm:$0xff]   ;;  %v426_v8 = vld [vmem:[%s516_s3 + $0x10] ss:$8 sps:$4 sm:$0xff]   ;;  %v262_v22 = vlaneseq }
   0xc   : > { %s402_s20 = sshll.u32 %s520_s19, 2  ;;  %v427_v9 = vld [vmem:[%s516_s3 + $0x4] ss:$8 sps:$4 sm:$0xff]   ;;  %308 = vmatprep.subr.bf16.mxu0 %v424_v7  ;;  %v440_v10 = vmov 0   ;;  %v429_v11 = vld [vmem:[%s516_s3] ss:$8 sps:$4 sm:$0xff]  }
   0xd   : > { %s216_s23 = scalar_lea.vmem %s513_s0, %s402_s20  ;;  %328 = vmatprep.mubr.bf16.mxu0 %v440_v10  ;;  %309 = vmatpush1.bf16.msra.mxu0 %v426_v8  ;;  %v405_v16 = vld [vmem:[%s514_s1] ss:$0 sm:$0xff]  ;;  %vm292_vm1 = vcmask 261120   ;;  %v263_v23 = vshrl.u32 %v262_v22, 7  ;;  %s414_s13 = sshll.u32 %s520_s19, 3 }
   0xe   : > { %v223_v0 = vld [vmem:[%s216_s23] sm:$0xf]  ;;  %310 = vmatprep.subr.bf16.mxu0 %v427_v9  ;;  %s221_s16 = scalar_lea.vmem %s518_s5, %s414_s13 }
   0xf   : > { %v227_v1 = vsel %vm226_vm0, %v223_v0, 0.0  ;;  %v406_v18 = vld [vmem:[%s515_s2] ss:$0 sm:$0xff]  ;;  %v264_v24 = vsub.s32 0, %v263_v23  ;;  %v268_v25 = vsub.s32 1, %v263_v23 }
  0x10   : > { %228 = vadd.xlane.f32.xlu0 %v227_v1  ;;  %v260_v26 = vld [vmem:[%s517_s4] sm:$0x3] }
  0x11   : > { %311 = vmatpush1.bf16.msra.mxu0 %v429_v11  ;;  %v265_v27 = vrot.slane %v260_v26, %v264_v24  ;;  %v269_v28 = vrot.slane %v260_v26, %v268_v25 }
  0x99   : > { %v229_v2 = vpop.xlane.xlu0 %228 }
  0x9a   : > { %v231_v3 = vmul.f32 0.03125, %v229_v2 }
  0x9c   : > { %v232_v4 = vsub.f32 %v223_v0, %v231_v3 }
  0x9e   : > { %v233_v5 = vmul.f32 %v232_v4, %v232_v4 }
  0xa0   : > { %v234_v6 = vsel %vm226_vm0, %v233_v5, 0.0 }
  0xa1   : > { %235 = vadd.xlane.f32.xlu0 %v234_v6 }
 0x12a   : > { %v236_v12 = vpop.xlane.xlu0 %235 }
 0x12b   : > { %v237_v13 = vmul.f32 0.03125, %v236_v12 }
 0x12d   : > { %v238_v14 = vadd.f32 1e-06, %v237_v13 }
 0x12f   : > { %430 = vrsqrt.f32 %v238_v14 }
 0x13c   : > { %v431_v15 = vpop.eup %430 }
 0x13d   : > { %v240_v17 = vmul.f32 %v431_v15, %v232_v4 }
 0x13f   : > { %v247_v19 = vmul.f32 %v405_v16, %v240_v17 }
 0x141   : > { %v254_v20 = vadd.f32 %v406_v18, %v247_v19 }
 0x143   : > { %v255_v21 = vpack.c.bf16 %v254_v20, %v254_v20 }
 0x145   : > { %411 = vmatmul.mubr.msk.bf16.vlgmr.msra.gmra.mxu0 %vm292_vm1, %v255_v21 }
 0x205   : > { %v330_v29 = vpop.f32.mrf.mxu0 }
 0x206   : > { %v331_v31 = vadd.f32 %v330_v29, %v265_v27 }
 0x207   : > { %v332_v30 = vpop.f32.mrf.mxu0 }
 0x208   : > { %v333_v32 = vadd.f32 %v332_v30, %v269_v28 }
 0x209   : > { %v334_v33 = vpop.f32.mrf.mxu0 }
 0x20a   : > { %v339_v34 = vcombine.low %v331_v31, %v333_v32 }
 0x20b   : > { %v335_v35 = vpop.f32.mrf.mxu0 }
 0x20c   : > { %341 = vst [vmem:[%s221_s16] sm:$0xff] %v339_v34 }
 0x20d PF: > { %s15_s18 = sadd.s32 1, %s438_s18  }
 0x20e   : > { %p12_p4 = scmp.ge.s32.totalorder %s15_s18, 4  }
 0x210   :  { %14 = sbr.rel (!%p12_p4) target bundleno = 1 (0x1), region = 70 }

// kernel: vqvae_forward.6
= control target key start
LH: loop header
LB: loop body
LE: loop exit
PB: predicated region body
PF: predicated region fallthrough
CT: control target
= control target key end

     0   :  { %s1323_s25 = smov 0   ;;  %s1458_s0 = inlined_call_operand.vmem [shape: f32[2,4,32], index: 0, kind: input, shape index: {}]   ;;  %s1459_s1 = inlined_call_operand.vmem [shape: f32[1,32], index: 1, kind: input, shape index: {}]   ;;  %s1460_s2 = inlined_call_operand.vmem [shape: f32[1,32], index: 2, kind: input, shape index: {}]   ;;  %s1461_s3 = inlined_call_operand.vmem [shape: bf16[32,96], index: 3, kind: input, shape index: {}]   ;;  %s1462_s4 = inlined_call_operand.vmem [shape: f32[1,96], index: 4, kind: input, shape index: {}]   ;;  %s1463_s5 = inlined_call_operand.vmem [shape: bf16[32,32], index: 5, kind: input, shape index: {}]   ;;  %s1464_s6 = inlined_call_operand.vmem [shape: f32[1,32], index: 6, kind: input, shape index: {}]   ;;  %s1465_s7 = inlined_call_operand.vmem [shape: f32[1,32], index: 7, kind: input, shape index: {}]   ;;  %s1466_s8 = inlined_call_operand.vmem [shape: f32[1,32], index: 8, kind: input, shape index: {}]   ;;  %s1467_s9 = inlined_call_operand.vmem [shape: bf16[32,64], index: 9, kind: input, shape index: {}]   ;;  %s1468_s10 = inlined_call_operand.vmem [shape: f32[1,64], index: 10, kind: input, shape index: {}]   ;;  %s1469_s11 = inlined_call_operand.vmem [shape: bf16[64,32], index: 11, kind: input, shape index: {}]   ;;  %s1470_s12 = inlined_call_operand.vmem [shape: f32[1,32], index: 12, kind: input, shape index: {}]   ;;  %s1471_s13 = inlined_call_operand.vmem [shape: f32[2,4,32], index: 13, kind: output, shape index: {}]  }
   0x1 LB: > { %s1080_s26 = sadd.s32 4294967295, %s1243_s25   ;;  %p1084_p0 = scmp.ge.s32.totalorder %s1243_s25, 1  ;;  %s1243_s25 = sphi %s1323_s25, %s23_s25  }
   0x2   : > { %p386_p1 = scmp.lt.s32.totalorder %s1243_s25, 3 }
   0x4   : > { %p387_p2 = pnand %p1084_p0, %p386_p1 }
   0x5   : > { %p428_p3 = scmp.lt.s32.totalorder (!%p387_p2), %s1080_s26, 1  ;;  %s1247_s24 = smov (!%p387_p2), 112  }
   0x6   : > { %390 = sbr.rel (%p387_p2) target bundleno = 2406 (0x966), region = 72  ;;  %s1248_s28 = smov (!%p387_p2), 96  }
   0x7   : > { %s1249_s29 = smov (!%p387_p2), 80   ;;  %s1251_s14 = smov (!%p387_p2), 64  }
   0x8   : > { %s1252_s19 = smov (!%p387_p2), 16  }
   0xb   : > { %s1473_s26 = smov (!%p428_p3, %s1080_s26), 1  ;;  %vm440_vm0 = vcmask 257024   ;;  %v1213_v7 = vld [vmem:[%s1461_s3 + $0x8] sm:$0xff]   ;;  %v1245_v8 = vmov 0.0   ;;  %vm1246_vm1 = vmmov 0   ;;  %v1214_v9 = vld [vmem:[%s1461_s3] sm:$0xff]  }
   0xc   : > { %s1085_s27 = sshll.u32 %s1473_s26, 2  ;;  %1137 = vmatprep.subr.bf16.mxu0 %v1245_v8  ;;  %1141 = vmatprep.mubr.msk.bf16.mxu0 %vm1246_vm1, %v1245_v8  ;;  %v1087_v14 = vld [vmem:[%s1459_s1] ss:$0 sm:$0xff]  ;;  %vm493_vm2 = vcmask 261120   ;;  %vm541_vm3 = vcmask 130048   ;;  %vm589_vm4 = vcmask 27648  }
   0xd   : > { %s431_s30 = scalar_lea.vmem %s1458_s0, %s1085_s27  ;;  %1138 = vmatpush3.bf16.msra.mxu0 %v1213_v7  ;;  %1145 = vmatprep.subr.bf16.mxu1 %v1245_v8  ;;  %v1088_v16 = vld [vmem:[%s1460_s2] ss:$0 sm:$0xff]  ;;  %vm608_vm5 = vcmask 1041408   ;;  %vm604_vm6 = vcmask 31744   ;;  %vm981_vm7 = vcmask 523264   ;;  %s435_s16 = scalar_lea.vmem %s1471_s13, %s1085_s27 }
   0xe   : > { %v1339_v0 = vld [vmem:[%s431_s30] sm:$0xf]  ;;  %1139 = vmatprep.subr.bf16.mxu0 %v1245_v8  ;;  %1147 = vmatprep.mubr.msk.bf16.mxu1 %vm1246_vm1, %v1245_v8  ;;  %s1250_s30 = smov 48  }
   0xf   : > { %v441_v1 = vsel %vm440_vm0, %v1339_v0, 0.0  ;;  %v1089_v20 = vld [vmem:[%s1462_s4] ss:$0 sm:$0xff] }
  0x10   : > { %442 = vadd.xlane.f32.xlu0 %v441_v1 }
  0x11   : > { %1140 = vmatpush3.bf16.msra.mxu0 %v1214_v9 }
  0x12   : > { %1151 = vmatprep.subr.bf16.mxu0 %v1245_v8 }
  0x99   : > { %v443_v2 = vpop.xlane.xlu0 %442 }
  0x9a   : > { %v445_v3 = vmul.f32 0.03125, %v443_v2 }
  0x9c   : > { %v446_v4 = vsub.f32 %v1339_v0, %v445_v3  ;;  %v1215_v3 = vld [vmem:[%s1463_s5 + $0x8] sm:$0xff]  }
  0x9e   : > { %v447_v5 = vmul.f32 %v446_v4, %v446_v4 }
  0xa0   : > { %v448_v6 = vsel %vm440_vm0, %v447_v5, 0.0 }
  0xa1   : > { %449 = vadd.xlane.f32.xlu0 %v448_v6 }
 0x12a   : > { %v450_v10 = vpop.xlane.xlu0 %449 }
 0x12b   : > { %v451_v11 = vmul.f32 0.03125, %v450_v10 }
 0x12d   : > { %v452_v12 = vadd.f32 1e-06, %v451_v11 }
 0x12f   : > { %1223 = vrsqrt.f32 %v452_v12 }
 0x13c   : > { %v1224_v13 = vpop.eup %1223 }
 0x13d   : > { %v454_v15 = vmul.f32 %v1224_v13, %v446_v4  ;;  %v1216_v4 = vld [vmem:[%s1463_s5] sm:$0xff]  }
 0x13f   : > { %v461_v17 = vmul.f32 %v1087_v14, %v454_v15 }
 0x141   : > { %v468_v18 = vadd.f32 %v1088_v16, %v461_v17  ;;  %v1097_v17 = vld [vmem:[%s1464_s6] ss:$0 sm:$0xff] }
 0x143   : > { %v469_v19 = vpack.c.bf16 %v468_v18, %v468_v18 }
 0x145   : > { %1142 = vmatmul.mubr.msk.bf16.vlgmr.msra.gmra.mxu0 %vm493_vm2, %v469_v19 }
 0x146   : > { %1153 = vmatprep.mubr.msk.bf16.mxu0 %vm1246_vm1, %v1245_v8 }
 0x205   : > { %v531_v21 = vpop.f32.mrf.mxu0 }
 0x206   : > { %v532_v22 = vadd.f32 %v1089_v20, %v531_v21 }
 0x207   : > { %v1143_v23 = vpop.f32.mrf.mxu0 }
 0x208   : > { %v537_v24 = vpack.c.bf16 %v532_v22, %v532_v22 }
 0x209   : > { %v534_v25 = vpop.f32.mrf.mxu0 }
 0x20a   : > { %652 = vrot.lane.b32.xlu0 %v537_v24, %s1247_s24  ;;  %539 = vrot.lane.b32.xlu1 %v537_v24, %s1248_s28 }
 0x20b   : > { %v1144_v26 = vpop.f32.mrf.mxu0 }
 0x20e   : > { %654 = vrot.lane.b32.xlu1 %v537_v24, %s1249_s29 }
 0x27c   : > { %v540_v27 = vpop.permute.xlu1 %539  ;;  %v653_v31 = vpop.permute.xlu0 %652 }
 0x27d   : > { %v546_v28 = vsel %vm541_vm3, %v540_v27, 0 }
 0x27e   : > { %1146 = vmatpush3.bf16.xpose.msra.mxu1 %v546_v28 }
 0x27f   : > { %1157 = vmatprep.subr.bf16.mxu1 %v1245_v8 }
 0x280   : > { %v655_v29 = vpop.permute.xlu1 %654 }
 0x281   : > { %v660_v30 = vsel %vm541_vm3, %v655_v29, 0 }
 0x285   : > { %1148 = vmatmul.mubr.msk.bf16.vlgmr.msra.gmra.mxu1 %vm541_vm3, %v537_v24 }
 0x286   : > { %1158 = vmatpush3.bf16.xpose.msra.mxu1 %v660_v30  ;;  %1159 = vmatprep.mubr.msk.bf16.mxu1 %vm1246_vm1, %v1245_v8  ;;  %v1217_v30 = vld [vmem:[%s1467_s9 + $0x8] sm:$0xff]  }
 0x287   : > { %1169 = vmatprep.subr.bf16.mxu1 %v1245_v8 }
 0x28d   : > { %1160 = vmatmul.mubr.msk.bf16.vlgmr.msra.gmra.mxu1 %vm541_vm3, %v653_v31 }
 0x28e   : > { %1173 = vmatprep.mubr.msk.bf16.mxu1 %vm1246_vm1, %v1245_v8  ;;  %1170 = vmatpush3.bf16.msra.mxu1 %v1215_v3 }
 0x28f   : > { %1171 = vmatprep.subr.bf16.mxu1 %v1245_v8 }
 0x292   : > { %1172 = vmatpush3.bf16.msra.mxu1 %v1216_v4 }
 0x293   : > { %1185 = vmatprep.subr.bf16.mxu1 %v1245_v8 }
 0x345   : > { %v582_v32 = vpop.f32.mrf.mxu1 }
 0x346   : > { %v588_v33 = vmul.f32 0.25, %v582_v32 }
 0x347   : > { %v1149_v34 = vpop.f32.mrf.mxu1 }
 0x348   : > { %v590_v35 = vsel %vm589_vm4, %v588_v33, -inf }
 0x349   : > { %591 = vmax.xlane.f32.xlu1 %v590_v35  ;;  %v585_v36 = vpop.f32.mrf.mxu1  ;;  %v1101_v35 = vld [vmem:[%s1465_s7] ss:$0 sm:$0xff] }
 0x34b   : > { %v1150_v37 = vpop.f32.mrf.mxu1 }
 0x34c   : > { %v1102_v37 = vld [vmem:[%s1466_s8] ss:$0 sm:$0xff] }
 0x34d   : > { %v696_v38 = vpop.f32.mrf.mxu1 }
 0x34e   : > { %v702_v39 = vmul.f32 0.25, %v696_v38 }
 0x34f   : > { %v1161_v40 = vpop.f32.mrf.mxu1 }
 0x350   : > { %v703_v41 = vsel %vm589_vm4, %v702_v39, -inf }
 0x351   : > { %704 = vmax.xlane.f32.xlu0 %v703_v41  ;;  %v699_v42 = vpop.f32.mrf.mxu1  ;;  %v1219_v41 = vld [vmem:[%s1469_s11 + $0x18] sm:$0xff]  }
 0x352   : > { %v1220_v42 = vld [vmem:[%s1469_s11 + $0x10] sm:$0xff]  }
 0x353   : > { %v1162_v43 = vpop.f32.mrf.mxu1 }
 0x354   : > { %v1221_v43 = vld [vmem:[%s1469_s11 + $0x8] sm:$0xff]  }
 0x367   : > { %715 = vrot.lane.b32.xlu0 %v537_v24, %s1250_s30 }
 0x3d2   : > { %v592_v44 = vpop.xlane.xlu1 %591 }
 0x3d3   : > { %v593_v45 = vsub.f32 %v588_v33, %v592_v44  ;;  %v1222_v44 = vld [vmem:[%s1469_s11] sm:$0xff]  }
 0x3d5   : > { %v594_v46 = vmul.f32 1.442695, %v593_v45  ;;  %v1103_v45 = vld [vmem:[%s1468_s10] ss:$0 sm:$0xff] }
 0x3d7   : > { %1225 = vpow2.f32 %v594_v46 }
 0x3da   : > { %v705_v47 = vpop.xlane.xlu0 %704 }
 0x3db   : > { %v706_v48 = vsub.f32 %v702_v39, %v705_v47 }
 0x3dd   : > { %v707_v49 = vmul.f32 1.442695, %v706_v48 }
 0x3de   : > { %v716_v60 = vpop.permute.xlu0 %715 }
 0x3df   : > { %1227 = vpow2.f32 %v707_v49  ;;  %v721_v62 = vsel %vm608_vm5, %v716_v60, 0  ;;  %v1107_v60 = vld [vmem:[%s1470_s12] ss:$0 sm:$0xff] }
 0x3e4   : > { %v1226_v50 = vpop.eup %1225 }
 0x3e5   : > { %v596_v51 = vsel %vm589_vm4, %v1226_v50, 0.0 }
 0x3e6   : > { %597 = vadd.xlane.f32.xlu1 %v596_v51 }
 0x3ec   : > { %v1228_v52 = vpop.eup %1227 }
 0x3ed   : > { %v709_v53 = vsel %vm589_vm4, %v1228_v52, 0.0 }
 0x3ee   : > { %710 = vadd.xlane.f32.xlu1 %v709_v53 }
 0x3ff   : > { %602 = vrot.lane.b32.xlu1 %v537_v24, %s1251_s14 }
 0x46f   : > { %v598_v54 = vpop.xlane.xlu1 %597 }
 0x470   : > { %1229 = vrcp.f32 %v598_v54 }
 0x477   : > { %v711_v55 = vpop.xlane.xlu1 %710 }
 0x478   : > { %1231 = vrcp.f32 %v711_v55 }
 0x47b   : > { %v603_v56 = vpop.permute.xlu1 %602 }
 0x47c   : > { %v610_v57 = vsel %vm608_vm5, %v603_v56, 0 }
 0x47d   : > { %v1230_v58 = vpop.eup %1229  ;;  %1152 = vmatpush3.bf16.msra.mxu0 %v610_v57 }
 0x47e   : > { %1163 = vmatprep.subr.bf16.mxu0 %v1245_v8  ;;  %v600_v59 = vmul.f32 %v1230_v58, %v1226_v50 }
 0x480   : > { %v601_v61 = vpack.c.bf16 %v600_v59, %v600_v59 }
 0x482   : > { %1154 = vmatmul.mubr.msk.bf16.vlgmr.msra.gmra.mxu0 %vm604_vm6, %v601_v61 }
 0x483   : > { %1164 = vmatpush3.bf16.msra.mxu0 %v721_v62  ;;  %1165 = vmatprep.mubr.msk.bf16.mxu0 %vm1246_vm1, %v1245_v8 }
 0x484   : > { %1177 = vmatprep.subr.bf16.mxu0 %v1245_v8 }
 0x485   : > { %v1232_v63 = vpop.eup %1231 }
 0x486   : > { %v713_v1 = vmul.f32 %v1232_v63, %v1228_v52 }
 0x488   : > { %v714_v2 = vpack.c.bf16 %v713_v1, %v713_v1 }
 0x48a   : > { %1166 = vmatmul.mubr.msk.bf16.vlgmr.msra.gmra.mxu0 %vm604_vm6, %v714_v2 }
 0x48b   : > { %1181 = vmatprep.mubr.msk.bf16.mxu0 %vm1246_vm1, %v1245_v8  ;;  %1178 = vmatpush3.bf16.msra.mxu0 %v1217_v30 }
 0x48c   : > { %1179 = vmatprep.subr.bf16.mxu0 %v1245_v8 }
 0x542   : > { %v646_v5 = vpop.f32.mrf.mxu0 }
 0x544   : > { %v1155_v6 = vpop.f32.mrf.mxu0 }
 0x546   : > { %v649_v7 = vpop.f32.mrf.mxu0 }
 0x548   : > { %v1156_v9 = vpop.f32.mrf.mxu0 }
 0x54a   : > { %v757_v10 = vpop.f32.mrf.mxu0 }
 0x54b   : > { %764 = vrot.lane.b32.xlu1 %v757_v10, %s1252_s19 }
 0x54c   : > { %v1167_v11 = vpop.f32.mrf.mxu0 }
 0x54e   : > { %v760_v12 = vpop.f32.mrf.mxu0 }
 0x550   : > { %v1168_v13 = vpop.f32.mrf.mxu0 }
 0x5bd   : > { %v765_v14 = vpop.permute.xlu1 %764 }
 0x5be   : > { %v767_v15 = vsel %vm541_vm3, %v646_v5, %v765_v14 }
 0x5bf   : > { %v768_v16 = vpack.c.bf16 %v767_v15, %v767_v15 }
 0x5c1   : > { %1174 = vmatmul.mubr.msk.bf16.vlgmr.msra.gmra.mxu1 %vm493_vm2, %v768_v16 }
 0x5c2   : > { %1193 = vmatprep.mubr.msk.bf16.mxu1 %vm1246_vm1, %v1245_v8  ;;  %1186 = vmatpush3.bf16.msra.mxu1 %v1219_v41 }
 0x5c3   : > { %1187 = vmatprep.subr.bf16.mxu1 %v1245_v8 }
 0x5c6   : > { %1188 = vmatpush3.bf16.msra.mxu1 %v1220_v42 }
 0x5c7   : > { %1189 = vmatprep.subr.bf16.mxu1 %v1245_v8 }
 0x5ca   : > { %1190 = vmatpush3.bf16.msra.mxu1 %v1221_v43 }
 0x5cb   : > { %1191 = vmatprep.subr.bf16.mxu1 %v1245_v8 }
 0x5ce   : > { %1192 = vmatpush3.bf16.msra.mxu1 %v1222_v44 }
 0x681   : > { %v829_v18 = vpop.f32.mrf.mxu1 }
 0x682   : > { %v830_v19 = vadd.f32 %v1097_v17, %v829_v18 }
 0x683   : > { %v1175_v20 = vpop.f32.mrf.mxu1 }
 0x684   : > { %v1407_v21 = vadd.f32 %v830_v19, %v1339_v0  ;;  %v1218_v0 = vld [vmem:[%s1467_s9] sm:$0xff]  }
 0x685   : > { %v832_v22 = vpop.f32.mrf.mxu1  ;;  %1180 = vmatpush3.bf16.msra.mxu0 %v1218_v0 }
 0x686   : > { %v838_v23 = vsel %vm440_vm0, %v1407_v21, 0.0 }
 0x687   : > { %839 = vadd.xlane.f32.xlu1 %v838_v23  ;;  %v1176_v24 = vpop.f32.mrf.mxu1 }
 0x710   : > { %v840_v25 = vpop.xlane.xlu1 %839 }
 0x711   : > { %v841_v26 = vmul.f32 0.03125, %v840_v25 }
 0x713   : > { %v842_v27 = vsub.f32 %v1407_v21, %v841_v26 }
 0x715   : > { %v843_v28 = vmul.f32 %v842_v27, %v842_v27 }
 0x717   : > { %v844_v29 = vsel %vm440_vm0, %v843_v28, 0.0 }
 0x718   : > { %845 = vadd.xlane.f32.xlu0 %v844_v29 }
 0x7a1   : > { %v846_v31 = vpop.xlane.xlu0 %845 }
 0x7a2   : > { %v847_v32 = vmul.f32 0.03125, %v846_v31 }
 0x7a4   : > { %v848_v33 = vadd.f32 1e-06, %v847_v32 }
 0x7a6   : > { %1233 = vrsqrt.f32 %v848_v33 }
 0x7b3   : > { %v1234_v34 = vpop.eup %1233 }
 0x7b4   : > { %v850_v36 = vmul.f32 %v1234_v34, %v842_v27 }
 0x7b6   : > { %v857_v38 = vmul.f32 %v1101_v35, %v850_v36 }
 0x7b8   : > { %v864_v39 = vadd.f32 %v1102_v37, %v857_v38 }
 0x7ba   : > { %v865_v40 = vpack.c.bf16 %v864_v39, %v864_v39 }
 0x7bc   : > { %1182 = vmatmul.mubr.msk.bf16.vlgmr.msra.gmra.mxu0 %vm493_vm2, %v865_v40 }
 0x87c   : > { %v926_v46 = vpop.f32.mrf.mxu0 }
 0x87d   : > { %v927_v47 = vadd.f32 %v1103_v45, %v926_v46 }
 0x87e   : > { %v1183_v48 = vpop.f32.mrf.mxu0 }
 0x87f   : > { %v932_v49 = vmul.f32 %v927_v47, %v927_v47 }
 0x880   : > { %v929_v50 = vpop.f32.mrf.mxu0 }
 0x881   : > { %v933_v51 = vmul.f32 %v932_v49, %v927_v47 }
 0x882   : > { %v1184_v52 = vpop.f32.mrf.mxu0 }
 0x883   : > { %v934_v53 = vmul.f32 0.044715, %v933_v51 }
 0x885   : > { %v935_v54 = vadd.f32 %v934_v53, %v927_v47 }
 0x887   : > { %v936_v8 = vmul.f32 0.7978846, %v935_v54 }
 0x889   : > { %1235 = vtanh.f32 %v936_v8 }
 0x896   : > { %v1236_v55 = vpop.eup %1235 }
 0x897   : > { %v938_v56 = vadd.f32 1.0, %v1236_v55 }
 0x899   : > { %v939_v57 = vmul.f32 0.5, %v938_v56 }
 0x89b   : > { %v940_v58 = vmul.f32 %v939_v57, %v927_v47 }
 0x89d   : > { %v941_v59 = vpack.c.bf16 %v940_v58, %v940_v58 }
 0x89f   : > { %1194 = vmatmul.mubr.msk.bf16.vlgmr.msra.gmra.mxu1 %vm981_vm7, %v941_v59 }
 0x95f   : > { %v1019_v61 = vpop.f32.mrf.mxu1 }
 0x960   : > { %v1020_v62 = vadd.f32 %v1107_v60, %v1019_v61 }
 0x961   : > { %v1195_v63 = vpop.f32.mrf.mxu1 }
 0x962   : > { %v1025_v1 = vadd.f32 %v1020_v62, %v1407_v21 }
 0x963   : > { %v1022_v2 = vpop.f32.mrf.mxu1 }
 0x964   : > { %1026 = vst.msk [vmem:[%s435_s16] sm:$0xf] %vm440_vm0, %v1025_v1 }
 0x965   : > { %v1196_v3 = vpop.f32.mrf.mxu1 }
 0x966 PF: > { %s23_s25 = sadd.s32 1, %s1243_s25  }
 0x967   : > { %p20_p4 = scmp.ge.s32.totalorder %s23_s25, 4  }
 0x969   :  { %22 = sbr.rel (!%p20_p4) target bundleno = 1 (0x1), region = 102 }

// kernel: vqvae_forward.7
= control target key start
LH: loop header
LB: loop body
LE: loop exit
PB: predicated region body
PF: predicated region fallthrough
CT: control target
= control target key end

     0   :  { %s1114_s13 = smov 0   ;;  %s1287_s0 = inlined_call_operand.vmem [shape: f32[2,4,32], index: 0, kind: input, shape index: {}]   ;;  %s1288_s1 = inlined_call_operand.vmem [shape: f32[1,32], index: 1, kind: input, shape index: {}]   ;;  %s1289_s2 = inlined_call_operand.vmem [shape: f32[1,32], index: 2, kind: input, shape index: {}]   ;;  %s1290_s3 = inlined_call_operand.vmem [shape: bf16[32,32], index: 3, kind: input, shape index: {}]   ;;  %s1291_s4 = inlined_call_operand.vmem [shape: f32[1,32], index: 4, kind: input, shape index: {}]   ;;  %s1292_s5 = inlined_call_operand.vmem [shape: f32[64,32], index: 5, kind: input, shape index: {}]   ;;  %s1293_s6 = inlined_call_operand.vmem [shape: bf16[32,32], index: 6, kind: input, shape index: {}]   ;;  %s1294_s7 = inlined_call_operand.vmem [shape: f32[1,32], index: 7, kind: input, shape index: {}]   ;;  %s1295_s8 = inlined_call_operand.vmem [shape: f32[4,32], index: 8, kind: input, shape index: {}]   ;;  %s1296_s9 = inlined_call_operand.vmem [shape: f32[2,4,32], index: 9, kind: output, shape index: {0}]   ;;  %s1297_s10 = inlined_call_operand.vmem [shape: f32[2,8,128], index: 10, kind: output, shape index: {1}]  }
   0x1 LB: > { %s904_s14 = sadd.s32 4294967295, %s1055_s13   ;;  %p908_p0 = scmp.ge.s32.totalorder %s1055_s13, 1  ;;  %s1055_s13 = sphi %s1114_s13, %s21_s13  }
   0x2   : > { %p314_p1 = scmp.lt.s32.totalorder %s1055_s13, 3 }
   0x4   : > { %p315_p2 = pnand %p908_p0, %p314_p1 }
   0x5   : > { %p354_p3 = scmp.lt.s32.totalorder (!%p315_p2), %s904_s14, 1 }
   0x6   : > { %318 = sbr.rel (%p315_p2) target bundleno = 1704 (0x6a8), region = 56 }
   0xb   : > { %s1299_s14 = smov (!%p354_p3, %s904_s14), 1  ;;  %vm370_vm0 = vcmask 257024   ;;  %v1025_v7 = vld [vmem:[%s1290_s3 + $0x8] sm:$0xff]   ;;  %v1057_v8 = vmov 0.0   ;;  %vm1058_vm1 = vmmov 0   ;;  %v1026_v9 = vld [vmem:[%s1290_s3] sm:$0xff]  }
   0xc   : > { %s909_s15 = sshll.u32 %s1299_s14, 2  ;;  %959 = vmatprep.subr.bf16.mxu0 %v1057_v8  ;;  %963 = vmatprep.mubr.msk.bf16.mxu0 %vm1058_vm1, %v1057_v8  ;;  %v481_v10 = vld [vmem:[%s1292_s5 + $0x38] sm:$0xff]  ;;  %v1152_v11 = vld [vmem:[%s1292_s5 + $0x30] sm:$0xff]  ;;  %v1157_v12 = vld [vmem:[%s1292_s5 + $0x28] sm:$0xff]  ;;  %vm423_vm2 = vcmask 261120   ;;  %vm635_vm3 = vcmask 519168  }
   0xd   : > { %s357_s18 = scalar_lea.vmem %s1287_s0, %s909_s15  ;;  %960 = vmatpush3.bf16.msra.mxu0 %v1025_v7  ;;  %967 = vmatprep.subr.mxu1 %v1057_v8  ;;  %v489_v13 = vmul.f32 %v481_v10, %v481_v10  ;;  %v488_v14 = vmul.f32 %v1152_v11, %v1152_v11  ;;  %v487_v15 = vmul.f32 %v1157_v12, %v1157_v12  ;;  %v1166_v16 = vld [vmem:[%s1292_s5 + $0x18] sm:$0xff]  ;;  %v1171_v17 = vld [vmem:[%s1292_s5 + $0x20] sm:$0xff]  ;;  %v1178_v19 = vld [vmem:[%s1292_s5 + $0x8] sm:$0xff]  ;;  %vm661_vm6 = vcmask 523264   ;;  %s361_s21 = scalar_lea.vmem %s1296_s9, %s909_s15 }
   0xe   : > { %v367_v0 = vld [vmem:[%s357_s18] sm:$0xf]  ;;  %961 = vmatprep.subr.bf16.mxu0 %v1057_v8  ;;  %983 = vmatprep.mubr.msk.f32.mxu1 %vm1058_vm1, %v1057_v8  ;;  %v485_v18 = vmul.f32 %v1166_v16, %v1166_v16  ;;  %v486_v23 = vmul.f32 %v1171_v17, %v1171_v17  ;;  %v483_v25 = vmul.f32 %v1178_v19, %v1178_v19  ;;  %v1191_v26 = vld [vmem:[%s1292_s5 + $0x10] sm:$0xff]  ;;  %s911_s22 = sshll.u32 %s1299_s14, 3 }
   0xf   : > { %v371_v1 = vsel %vm370_vm0, %v367_v0, 0.0  ;;  %v511_v20 = vsel %vm423_vm2, %v489_v13, 0.0  ;;  %v505_v21 = vsel %vm423_vm2, %v487_v15, 0.0  ;;  %v508_v22 = vsel %vm423_vm2, %v488_v14, 0.0  ;;  %v912_v35 = vld [vmem:[%s1288_s1] ss:$0 sm:$0xff]  ;;  %s365_s26 = scalar_lea.vmem %s1297_s10, %s911_s22 }
  0x10   : > { %372 = vadd.xlane.f32.xlu0 %v371_v1  ;;  %512 = vadd.xlane.f32.xlu1 %v511_v20  ;;  %v499_v24 = vsel %vm423_vm2, %v485_v18, 0.0  ;;  %v502_v27 = vsel %vm423_vm2, %v486_v23, 0.0  ;;  %v484_v28 = vmul.f32 %v1191_v26, %v1191_v26  ;;  %v493_v29 = vsel %vm423_vm2, %v483_v25, 0.0  ;;  %v913_v37 = vld [vmem:[%s1289_s2] ss:$0 sm:$0xff] }
  0x11   : > { %962 = vmatpush3.bf16.msra.mxu0 %v1026_v9  ;;  %v1210_v41 = vld [vmem:[%s1292_s5] sm:$0xff] }
  0x12   : > { %986 = vmatprep.subr.mxu0 %v1057_v8  ;;  %v496_v30 = vsel %vm423_vm2, %v484_v28, 0.0  ;;  %v482_v42 = vmul.f32 %v1210_v41, %v1210_v41  ;;  %v639_v28 = vlaneseq }
  0x14   : > { %509 = vadd.xlane.f32.xlu1 %v508_v22  ;;  %v490_v43 = vsel %vm423_vm2, %v482_v42, 0.0 }
  0x18   : > { %503 = vadd.xlane.f32.xlu1 %v502_v27 }
  0x1c   : > { %497 = vadd.xlane.f32.xlu1 %v496_v30 }
  0x20   : > { %491 = vadd.xlane.f32.xlu1 %v490_v43 }
  0x99   : > { %v373_v2 = vpop.xlane.xlu0 %372  ;;  %v513_v44 = vpop.xlane.xlu1 %512 }
  0x9a   : > { %v375_v3 = vmul.f32 0.03125, %v373_v2  ;;  %v521_v46 = vadd.f32 1e-12, %v513_v44  ;;  %v1027_v44 = vld [vmem:[%s1293_s6 + $0x8] sm:$0xff]  }
  0x9c   : > { %v376_v4 = vsub.f32 %v367_v0, %v375_v3  ;;  %v914_v0 = vld [vmem:[%s1291_s4] ss:$0 sm:$0xff] }
  0x9d   : > { %v510_v48 = vpop.xlane.xlu1 %509 }
  0x9e   : > { %v377_v5 = vmul.f32 %v376_v4, %v376_v4  ;;  %v520_v49 = vadd.f32 1e-12, %v510_v48 }
  0xa0   : > { %v378_v6 = vsel %vm370_vm0, %v377_v5, 0.0 }
  0xa1   : > { %379 = vadd.xlane.f32.xlu0 %v378_v6  ;;  %v504_v50 = vpop.xlane.xlu1 %503 }
  0xa2   : > { %v518_v51 = vadd.f32 1e-12, %v504_v50 }
  0xa5   : > { %506 = vadd.xlane.f32.xlu0 %v505_v21  ;;  %v498_v61 = vpop.xlane.xlu1 %497 }
  0xa6   : > { %v516_v1 = vadd.f32 1e-12, %v498_v61  ;;  %v817_v61 = vld [vmem:[%s1295_s8] sm:$0xf] }
  0xa9   : > { %500 = vadd.xlane.f32.xlu0 %v499_v24 }
  0xad   : > { %494 = vadd.xlane.f32.xlu0 %v493_v29  ;;  %v640_v29 = vand.u32 127, %v639_v28 }
 0x12a   : > { %v380_v31 = vpop.xlane.xlu0 %379 }
 0x12b   : > { %v381_v32 = vmul.f32 0.03125, %v380_v31 }
 0x12d   : > { %v382_v33 = vadd.f32 1e-06, %v381_v32 }
 0x12e   : > { %v507_v45 = vpop.xlane.xlu0 %506 }
 0x12f   : > { %1029 = vrsqrt.f32 %v382_v33  ;;  %v519_v47 = vadd.f32 1e-12, %v507_v45 }
 0x130   : > { %1031 = vrsqrt.f32 %v521_v46  ;;  %v1028_v46 = vld [vmem:[%s1293_s6] sm:$0xff]  }
 0x131   : > { %1033 = vrsqrt.f32 %v519_v47 }
 0x132   : > { %1035 = vrsqrt.f32 %v520_v49  ;;  %v501_v60 = vpop.xlane.xlu0 %500 }
 0x133   : > { %1037 = vrsqrt.f32 %v518_v51  ;;  %v517_v63 = vadd.f32 1e-12, %v501_v60 }
 0x135   : > { %1039 = vrsqrt.f32 %v517_v63 }
 0x136   : > { %v495_v62 = vpop.xlane.xlu0 %494  ;;  %1041 = vrsqrt.f32 %v516_v1 }
 0x137   : > { %v515_v2 = vadd.f32 1e-12, %v495_v62 }
 0x139   : > { %1043 = vrsqrt.f32 %v515_v2 }
 0x13c   : > { %v1030_v34 = vpop.eup %1029 }
 0x13d   : > { %v384_v36 = vmul.f32 %v1030_v34, %v376_v4  ;;  %v1032_v52 = vpop.eup %1031 }
 0x13e   : > { %v537_v53 = vmul.f32 %v1032_v52, %v481_v10  ;;  %v1034_v54 = vpop.eup %1033 }
 0x13f   : > { %v391_v38 = vmul.f32 %v912_v35, %v384_v36  ;;  %v1036_v55 = vpop.eup %1035  ;;  %v535_v57 = vmul.f32 %v1034_v54, %v1157_v12 }
 0x140   : > { %968 = vmatpush3.xpose.msk.msra.mxu1 %vm423_vm2, %v537_v53  ;;  %v536_v56 = vmul.f32 %v1036_v55, %v1152_v11  ;;  %v1038_v58 = vpop.eup %1037  ;;  %v492_v11 = vpop.xlane.xlu1 %491 }
 0x141   : > { %v398_v39 = vadd.f32 %v913_v37, %v391_v38  ;;  %969 = vmatprep.subr.mxu1 %v1057_v8  ;;  %v534_v59 = vmul.f32 %v1038_v58, %v1171_v17  ;;  %v514_v12 = vadd.f32 1e-12, %v492_v11 }
 0x142   : > { %v1040_v13 = vpop.eup %1039 }
 0x143   : > { %v399_v40 = vpack.c.bf16 %v398_v39, %v398_v39  ;;  %v1042_v14 = vpop.eup %1041  ;;  %1045 = vrsqrt.f32 %v514_v12  ;;  %v533_v17 = vmul.f32 %v1040_v13, %v1166_v16 }
 0x144   : > { %970 = vmatpush3.xpose.msk.msra.mxu1 %vm423_vm2, %v536_v56  ;;  %v532_v18 = vmul.f32 %v1042_v14, %v1191_v26 }
 0x145   : > { %964 = vmatmul.mubr.msk.bf16.vlgmr.msra.gmra.mxu0 %vm423_vm2, %v399_v40  ;;  %971 = vmatprep.subr.mxu1 %v1057_v8 }
 0x146   : > { %1002 = vmatprep.mubr.msk.f32.mxu0 %vm1058_vm1, %v1057_v8  ;;  %987 = vmatpush3.msra.mxu0 %v537_v53  ;;  %v1044_v15 = vpop.eup %1043 }
 0x147   : > { %988 = vmatprep.subr.mxu0 %v1057_v8  ;;  %v531_v20 = vmul.f32 %v1044_v15, %v1178_v19 }
 0x148   : > { %989 = vmatpush3.msra.mxu0 %v536_v56  ;;  %972 = vmatpush3.xpose.msk.msra.mxu1 %vm423_vm2, %v535_v57 }
 0x149   : > { %990 = vmatprep.subr.mxu0 %v1057_v8  ;;  %973 = vmatprep.subr.mxu1 %v1057_v8 }
 0x14a   : > { %991 = vmatpush3.msra.mxu0 %v535_v57 }
 0x14b   : > { %992 = vmatprep.subr.mxu0 %v1057_v8 }
 0x14c   : > { %993 = vmatpush3.msra.mxu0 %v534_v59  ;;  %974 = vmatpush3.xpose.msk.msra.mxu1 %vm423_vm2, %v534_v59  ;;  %v929_v59 = vld [vmem:[%s1294_s7] ss:$0 sm:$0xff] }
 0x14d   : > { %994 = vmatprep.subr.mxu0 %v1057_v8  ;;  %975 = vmatprep.subr.mxu1 %v1057_v8 }
 0x14e   : > { %995 = vmatpush3.msra.mxu0 %v533_v17 }
 0x14f   : > { %996 = vmatprep.subr.mxu0 %v1057_v8 }
 0x150   : > { %976 = vmatpush3.xpose.msk.msra.mxu1 %vm423_vm2, %v533_v17  ;;  %997 = vmatpush3.msra.mxu0 %v532_v18  ;;  %v1046_v16 = vpop.eup %1045 }
 0x151   : > { %977 = vmatprep.subr.mxu1 %v1057_v8  ;;  %998 = vmatprep.subr.mxu0 %v1057_v8  ;;  %v530_v19 = vmul.f32 %v1046_v16, %v1210_v41 }
 0x152   : > { %999 = vmatpush3.msra.mxu0 %v531_v20 }
 0x153   : > { %1000 = vmatprep.subr.mxu0 %v1057_v8 }
 0x154   : > { %978 = vmatpush3.xpose.msk.msra.mxu1 %vm423_vm2, %v532_v18  ;;  %1001 = vmatpush3.msra.mxu0 %v530_v19 }
 0x155   : > { %979 = vmatprep.subr.mxu1 %v1057_v8  ;;  %1005 = vmatprep.subr.bf16.mxu0 %v1057_v8 }
 0x158   : > { %980 = vmatpush3.xpose.msk.msra.mxu1 %vm423_vm2, %v531_v20 }
 0x159   : > { %981 = vmatprep.subr.mxu1 %v1057_v8 }
 0x15c   : > { %982 = vmatpush3.xpose.msk.msra.mxu1 %vm423_vm2, %v530_v19 }
 0x205   : > { %v461_v3 = vpop.f32.mrf.mxu0 }
 0x206   : > { %v1233_v4 = vadd.f32 %v914_v0, %v461_v3 }
 0x207   : > { %v965_v5 = vpop.f32.mrf.mxu0 }
 0x208   : > { %v467_v6 = vmul.f32 %v1233_v4, %v1233_v4 }
 0x209   : > { %v464_v7 = vpop.f32.mrf.mxu0 }
 0x20a   : > { %v468_v9 = vsel %vm370_vm0, %v467_v6, 0.0 }
 0x20b   : > { %469 = vadd.xlane.f32.xlu0 %v468_v9  ;;  %v966_v10 = vpop.f32.mrf.mxu0 }
 0x294   : > { %v470_v21 = vpop.xlane.xlu0 %469 }
 0x295   : > { %v471_v22 = vadd.f32 1e-12, %v470_v21 }
 0x297   : > { %1047 = vrsqrt.f32 %v471_v22 }
 0x2a4   : > { %v1048_v23 = vpop.eup %1047 }
 0x2a5   : > { %v473_v24 = vmul.f32 %v1048_v23, %v1233_v4 }
 0x2a7   : > { %984 = vmatmul.mubr.msk.f32.vlgmr.msra.gmra.mxu1 %vm423_vm2, %v473_v24 }
 0x367   : > { %v631_v25 = vpop.f32.mrf.mxu1 }
 0x368   : > { %v636_v26 = vsel %vm635_vm3, %v631_v25, -inf }
 0x369   : > { %637 = vmax.xlane.f32.xlu1 %v636_v26  ;;  %v985_v27 = vpop.f32.mrf.mxu1 }
 0x3f2   : > { %v638_v30 = vpop.xlane.xlu1 %637 }
 0x3f3   : > { %vm641_vm4 = vcmp.eq.f32.partialorder %v631_v25, %v638_v30 }
 0x3f4   : > { %v642_v31 = vsel %vm641_vm4, %v640_v29, 64 }
 0x3f5   : > { %v643_v32 = vsel %vm635_vm3, %v642_v31, 2147483647 }
 0x3f6   : > { %v645_v33 = vshra.s32 %v643_v32, 16  ;;  %v644_v35 = vand.u32 65535, %v643_v32 }
 0x3f8   : > { %v647_v34 = vcvt.s32.f32 %v645_v33  ;;  %v646_v37 = vcvt.s32.f32 %v644_v35 }
 0x3fa   : > { %648 = vmin.xlane.f32.xlu0 %v647_v34 }
 0x483   : > { %v649_v36 = vpop.xlane.xlu0 %648 }
 0x484   : > { %vm650_vm5 = vcmp.eq.f32.partialorder %v647_v34, %v649_v36  ;;  %v655_v39 = vcvt.f32.s32 %v649_v36 }
 0x485   : > { %v651_v38 = vsel %vm650_vm5, %v646_v37, inf }
 0x486   : > { %652 = vmin.xlane.f32.xlu1 %v651_v38  ;;  %v656_v41 = vshll.u32 %v655_v39, 16 }
 0x50f   : > { %v653_v40 = vpop.xlane.xlu1 %652 }
 0x510   : > { %v654_v42 = vcvt.f32.s32 %v653_v40 }
 0x512   : > { %v657_v43 = vadd.s32 %v656_v41, %v654_v42 }
 0x514   : > { %vm658_vm7 = vcmp.eq.s32.totalorder %v640_v29, %v657_v43 }
 0x515   : > { %v927_v45 = vsel %vm658_vm7, 1.0, %v1057_v8 }
 0x516   : > { %1003 = vmatmul.mubr.msk.f32.vlgmr.msra.gmra.mxu0 %vm661_vm6, %v927_v45 }
 0x517   : > { %1006 = vmatpush3.bf16.msra.mxu0 %v1027_v44  ;;  %1009 = vmatprep.mubr.msk.bf16.mxu0 %vm1058_vm1, %v1057_v8 }
 0x518   : > { %1007 = vmatprep.subr.bf16.mxu0 %v1057_v8 }
 0x51b   : > { %1008 = vmatpush3.bf16.msra.mxu0 %v1028_v46 }
 0x5d6   : > { %v731_v47 = vpop.f32.mrf.mxu0 }
 0x5d7   : > { %v735_v48 = vsub.f32 %v731_v47, %v1233_v4  ;;  %v750_v49 = vpack.c.bf16 %v731_v47, %v731_v47 }
 0x5d8   : > { %v1004_v50 = vpop.f32.mrf.mxu0 }
 0x5d9   : > { %v736_v51 = vmul.f32 %v735_v48, %v735_v48  ;;  %1010 = vmatmul.mubr.msk.bf16.vlgmr.msra.gmra.mxu0 %vm423_vm2, %v750_v49 }
 0x5db   : > { %v737_v52 = vsel %vm370_vm0, %v736_v51, 0.0 }
 0x5dc   : > { %738 = vadd.xlane.f32.xlu0 %v737_v52 }
 0x665   : > { %v739_v53 = vpop.xlane.xlu0 %738 }
 0x666   : > { %v740_v54 = vrot.slane %v739_v53, 4 }
 0x668   : > { %v741_v8 = vadd.f32 %v740_v54, %v739_v53 }
 0x66a   : > { %v742_v55 = vrot.slane %v741_v8, 2 }
 0x66c   : > { %v743_v56 = vadd.f32 %v742_v55, %v741_v8 }
 0x66e   : > { %v744_v57 = vrot.slane %v743_v56, 1 }
 0x670   : > { %v745_v58 = vadd.f32 %v744_v57, %v743_v56 }
 0x672   : > { %1013 = vpush %v745_v58 }
 0x699   : > { %v811_v60 = vpop.f32.mrf.mxu0 }
 0x69a   : > { %v812_v62 = vadd.f32 %v929_v59, %v811_v60 }
 0x69b   : > { %v1011_v63 = vpop.f32.mrf.mxu0 }
 0x69c   : > { %v818_v0 = vadd.f32 %v817_v61, %v812_v62 }
 0x69d   : > { %v814_v1 = vpop.f32.mrf.mxu0 }
 0x69e   : > { %819 = vst.msk [vmem:[%s361_s21] sm:$0xf] %vm370_vm0, %v818_v0 }
 0x69f   : > { %v1012_v2 = vpop.f32.mrf.mxu0 }
 0x6a3   : > { %s1014_s23 = spop %1013 }
 0x6a4   : > { %s747_s27 = smul.f32 0.00390625, %s1014_s23 }
 0x6a6   : > { %v748_v3 = vstv %s747_s27 }
 0x6a7   : > { %749 = vst [vmem:[%s365_s26] sm:$0xff] %v748_v3 }
 0x6a8 PF: > { %s21_s13 = sadd.s32 1, %s1055_s13  }
 0x6a9   : > { %p18_p4 = scmp.ge.s32.totalorder %s21_s13, 4  }
 0x6ab   :  { %20 = sbr.rel (!%p18_p4) target bundleno = 1 (0x1), region = 98 }

</bundles_post_ra>
